<compile_context>
chip_gen: v5e
topology: v5e:2x2
jax: 0.10.0
libtpu: 0.0.40
codegen_flags: <defaults>
</compile_context>

<pallas_src>
import functools

import jax
import jax.numpy as jnp
from jax.experimental import pallas as pl
from jax.experimental.pallas import tpu as pltpu

LN_EPS = 1e-5            # nn.LayerNorm default
_INV_SQRT2 = 0.7071067811865476


def _round_up(a, b):
    return (a + b - 1) // b * b


def _cdiv(a, b):
    return -(-a // b)


def _pad_to(a, shape):
    pads = [(0, t - s) for s, t in zip(a.shape, shape)]
    if any(p[1] for p in pads):
        a = jnp.pad(a, pads)
    return a


def _aligned_size(n):
    """Lane-dense feature size. Prefer 256 alignment (v6e/v7x MXU passes are
    256 wide) when the extra padding over 128-alignment is small (<10%)."""
    r128 = _round_up(n, 128)
    r256 = _round_up(n, 256)
    return r256 if (r256 - r128) <= 0.10 * r128 else r128


def _default_vmem_limit_bytes():
    """~80% of physical per-TC VMEM; 64 MiB fallback."""
    try:
        cap = getattr(pltpu.get_tpu_info(), "vmem_capacity_bytes", None)
        if cap:
            return int(cap * 0.8)
    except Exception:
        pass
    return 64 * 1024 * 1024


def _layernorm(x, w, b, n_valid):
    # x: (tm, Hp) f32, zero-padded on lanes >= n_valid (see invariant above).
    # w, b: (1, Hp) f32, zero-padded.  Stats use the true feature count.
    inv_n = 1.0 / n_valid
    mu = jnp.sum(x, axis=-1, keepdims=True) * inv_n      # padded lanes are 0
    xc = x - mu
    sq = xc * xc
    if n_valid != x.shape[-1]:            # static branch: only when padded
        lane = jax.lax.broadcasted_iota(jnp.int32, x.shape, 1)
        sq = jnp.where(lane < n_valid, sq, 0.0)
    var = jnp.sum(sq, axis=-1, keepdims=True) * inv_n
    return xc * jax.lax.rsqrt(var + LN_EPS) * w + b


def _gelu_exact(x):
    # nn.GELU() default = exact erf-based gelu.
    return 0.5 * x * (1.0 + jax.lax.erf(x * _INV_SQRT2))


def gpt_block_kernel(x_ref,
                     ln1w_ref, ln1b_ref,
                     attnw_ref, attnb_ref,
                     ln2w_ref, ln2b_ref,
                     fc1w_ref, fc1b_ref,
                     fc2w_ref, fc2b_ref,
                     o_ref, *, h_valid, i_chunk):
    x = x_ref[...].astype(jnp.float32)
    mm_dtype = attnw_ref.dtype            # bf16 by default

    # --- attention_proj branch ---
    normed = _layernorm(x, ln1w_ref[...], ln1b_ref[...], h_valid)
    attn = jnp.dot(normed.astype(mm_dtype), attnw_ref[...],
                   preferred_element_type=jnp.float32) + attnb_ref[...]
    x = x + attn

    # --- MLP branch, chunked over the intermediate dim ---
    normed = _layernorm(x, ln2w_ref[...], ln2b_ref[...], h_valid)
    normed_mm = normed.astype(mm_dtype)
    acc = jnp.zeros(x.shape, jnp.float32)
    ip = fc1w_ref.shape[1]
    for c in range(ip // i_chunk):        # static, fully unrolled
        lo, hi = c * i_chunk, (c + 1) * i_chunk
        h = jnp.dot(normed_mm, fc1w_ref[:, lo:hi],
                    preferred_element_type=jnp.float32) + fc1b_ref[:, lo:hi]
        h = _gelu_exact(h)
        acc = acc + jnp.dot(h.astype(mm_dtype), fc2w_ref[lo:hi, :],
                            preferred_element_type=jnp.float32)

    o_ref[...] = (x + acc + fc2b_ref[...]).astype(o_ref.dtype)


def prepare_params(params, *, matmul_dtype=jnp.bfloat16, feature_align=None):
    """One-time pad + cast of weights/biases (hoisted out of the hot path)."""
    H = params["attn_w"].shape[0]
    I = params["fc1_w"].shape[1]
    if feature_align:
        Hp, Ip = _round_up(H, feature_align), _round_up(I, feature_align)
    else:
        Hp, Ip = _aligned_size(H), _aligned_size(I)
    wdt = jnp.dtype(matmul_dtype)
    f32 = jnp.float32
    return {
        "_prepared": True, "H": H, "I": I, "Hp": Hp, "Ip": Ip, "wdt": wdt,
        "attn_w": _pad_to(params["attn_w"], (Hp, Hp)).astype(wdt),
        "fc1_w": _pad_to(params["fc1_w"], (Hp, Ip)).astype(wdt),
        "fc2_w": _pad_to(params["fc2_w"], (Ip, Hp)).astype(wdt),
        "ln1_w": _pad_to(params["ln1_w"].astype(f32), (1, Hp)),
        "ln1_b": _pad_to(params["ln1_b"].astype(f32), (1, Hp)),
        "ln2_w": _pad_to(params["ln2_w"].astype(f32), (1, Hp)),
        "ln2_b": _pad_to(params["ln2_b"].astype(f32), (1, Hp)),
        "attn_b": _pad_to(params["attn_b"].astype(f32), (1, Hp)),
        "fc1_b": _pad_to(params["fc1_b"].astype(f32), (1, Ip)),
        "fc2_b": _pad_to(params["fc2_b"].astype(f32), (1, Hp)),
    }


def gpt_block(x, params, *, tm=256, matmul_dtype=jnp.bfloat16, i_chunk=None,
              single_buffer_weights=True, vmem_limit_bytes=None):
    """x: (B, S, H) float32.  `params` may be raw (init_params) or prepared
    (prepare_params); pass prepared params to avoid per-call pad/cast traffic.
    Returns (B, S, H)."""
    if not params.get("_prepared", False):
        params = prepare_params(params, matmul_dtype=matmul_dtype)

    B, S, H = x.shape
    assert H == params["H"]
    I, Hp, Ip, wdt = params["I"], params["Hp"], params["Ip"], params["wdt"]
    M = B * S

    if vmem_limit_bytes is None:
        vmem_limit_bytes = _default_vmem_limit_bytes()

    # Intermediate-dim chunk width (512-1024 keeps MXU passes big while the
    # (tm, i_chunk) GELU intermediate stays ~1-2 MiB).
    if i_chunk is None:
        i_chunk = Ip
        for cand in (1024, 512, 256, 128):
            if Ip > cand and Ip % cand == 0:
                i_chunk = cand
                break
    assert Ip % i_chunk == 0

    weight_bytes = (Hp * Hp + 2 * Hp * Ip) * wdt.itemsize
    if not single_buffer_weights:
        weight_bytes *= 2

    def tile_bytes(t):                    # rough per-tile VMEM estimate
        rows = 2 * 2 * t * Hp * 4         # in + out, double-buffered, f32
        inter = t * i_chunk * 6 + 3 * t * Hp * 4   # gelu f32+bf16, x/normed/acc
        return rows + inter

    # Row tile: clamp to M, shrink to fit the VMEM budget instead of spilling,
    # then balance tiles (padding < 8 rows) and force >= 2 grid steps when M
    # allows so both v7x TensorCores get work.
    tm_t = max(8, _round_up(min(tm, _round_up(M, 8)), 8))
    while tm_t > 64 and weight_bytes + tile_bytes(tm_t) > 0.7 * vmem_limit_bytes:
        tm_t //= 2
    grid_n = _cdiv(M, tm_t)
    if grid_n < 2 <= M // 8:
        grid_n = 2
    tm_t = _round_up(_cdiv(M, grid_n), 8)
    grid_n = _cdiv(M, tm_t)
    Mp = grid_n * tm_t

    x2 = _pad_to(x.reshape(M, H).astype(jnp.float32), (Mp, Hp))

    row_spec = pl.BlockSpec((tm_t, Hp), lambda i: (i, 0))

    def make_in_specs(single_buffer):
        def const_spec(shape):
            index_map = lambda i: (0,) * len(shape)
            if single_buffer:
                # Constant index map -> data never changes across the grid, so
                # one VMEM buffer suffices (halves resident-weight VMEM).
                return pl.BlockSpec(shape, index_map,
                                    pipeline_mode=pl.Buffered(1))
            return pl.BlockSpec(shape, index_map)
        return [row_spec,
                const_spec((1, Hp)), const_spec((1, Hp)),    # ln1 w, b
                const_spec((Hp, Hp)), const_spec((1, Hp)),   # attn W, b
                const_spec((1, Hp)), const_spec((1, Hp)),    # ln2 w, b
                const_spec((Hp, Ip)), const_spec((1, Ip)),   # fc1 W, b
                const_spec((Ip, Hp)), const_spec((1, Hp))]   # fc2 W, b

    flops = 2 * Mp * (Hp * Hp + 2 * Hp * Ip)
    bytes_accessed = (2 * Mp * Hp * 4
                      + (Hp * Hp + 2 * Hp * Ip) * wdt.itemsize
                      + (6 * Hp + Ip) * 4)
    cost = pl.CostEstimate(flops=int(flops), transcendentals=int(Mp * Ip),
                           bytes_accessed=int(bytes_accessed))

    kernel = functools.partial(gpt_block_kernel, h_valid=H, i_chunk=i_chunk)
    args = (x2,
            params["ln1_w"], params["ln1_b"],
            params["attn_w"], params["attn_b"],
            params["ln2_w"], params["ln2_b"],
            params["fc1_w"], params["fc1_b"],
            params["fc2_w"], params["fc2_b"])

    def run(single_buffer):
        return pl.pallas_call(
            kernel,
            out_shape=jax.ShapeDtypeStruct((Mp, Hp), x.dtype),
            grid=(grid_n,),
            in_specs=make_in_specs(single_buffer),
            out_specs=row_spec,
            compiler_params=pltpu.CompilerParams(
                dimension_semantics=("parallel",),
                vmem_limit_bytes=int(vmem_limit_bytes)),
            cost_estimate=cost,
        )(*args)

    if single_buffer_weights:
        try:
            out = run(True)
        except Exception:
            # Some jax versions may not honor pl.Buffered; fall back to
            # default (double-buffered) constant operands.
            out = run(False)
    else:
        out = run(False)

    return out[:M, :H].reshape(B, S, H)


def init_params(key, hidden_size, intermediate_size):
    """Deterministic synthetic init (not a checkpoint load)."""
    ks = jax.random.split(key, 6)
    H, I = hidden_size, intermediate_size
    scale_h = 1.0 / jnp.sqrt(H)
    scale_i = 1.0 / jnp.sqrt(I)
    return {
        # LayerNorm: gamma=1, beta=0 (PyTorch default)
        "ln1_w": jnp.ones((1, H), jnp.float32),
        "ln1_b": jnp.zeros((1, H), jnp.float32),
        "ln2_w": jnp.ones((1, H), jnp.float32),
        "ln2_b": jnp.zeros((1, H), jnp.float32),
        # Linear weights stored as (in, out)
        "attn_w": jax.random.normal(ks[0], (H, H), jnp.float32) * scale_h,
        "attn_b": jax.random.normal(ks[1], (1, H), jnp.float32) * scale_h,
        "fc1_w": jax.random.normal(ks[2], (H, I), jnp.float32) * scale_h,
        "fc1_b": jax.random.normal(ks[3], (1, I), jnp.float32) * scale_h,
        "fc2_w": jax.random.normal(ks[4], (I, H), jnp.float32) * scale_i,
        "fc2_b": jax.random.normal(ks[5], (1, H), jnp.float32) * scale_i,
    }


def gpt_block_ref(x, p, matmul_dtype=jnp.float32):
    """Pure-JAX reference of the PyTorch forward (optionally mirroring the
    kernel's bf16 matmul-input dtype, always accumulating in f32)."""
    def ln(v, w, b):
        mu = jnp.mean(v, -1, keepdims=True)
        var = jnp.mean((v - mu) ** 2, -1, keepdims=True)
        return (v - mu) * jax.lax.rsqrt(var + LN_EPS) * w[0] + b[0]

    def mm(a, w):
        return jnp.dot(a.astype(matmul_dtype), w.astype(matmul_dtype),
                       preferred_element_type=jnp.float32)

    normed = ln(x, p["ln1_w"], p["ln1_b"])
    x = x + mm(normed, p["attn_w"]) + p["attn_b"][0]
    normed = ln(x, p["ln2_w"], p["ln2_b"])
    h = mm(normed, p["fc1_w"]) + p["fc1_b"][0]
    h = _gelu_exact(h)
    return x + mm(h, p["fc2_w"]) + p["fc2_b"][0]


if __name__ == "__main__":
    B, S, H, I = 2, 8, 32, 128   # small shapes consistent with the module

    key = jax.random.PRNGKey(0)
    kx, kp = jax.random.split(key)
    x = jax.random.normal(kx, (B, S, H), jnp.float32)
    params = init_params(kp, H, I)

    prepared = prepare_params(params)        # one-time pad + bf16 cast
    out = jax.block_until_ready(gpt_block(x, prepared))
    assert out.shape == (B, S, H)

    # Tight check against a reference mirroring the kernel's bf16 MXU inputs.
    ref_bf16 = gpt_block_ref(x, params, matmul_dtype=jnp.bfloat16)
    assert jnp.allclose(out, ref_bf16, atol=5e-3, rtol=5e-3), \
        float(jnp.max(jnp.abs(out - ref_bf16)))

    # Loose check against the pure-f32 PyTorch-equivalent forward (bf16 budget).
    ref_f32 = gpt_block_ref(x, params, matmul_dtype=jnp.float32)
    assert jnp.allclose(out, ref_f32, atol=5e-2, rtol=5e-2), \
        float(jnp.max(jnp.abs(out - ref_f32)))

    print("KERNEL_OK")
</pallas_src>

<mosaic_0001>
module attributes {stable_mosaic.version = 11 : i64} {
  func.func @gpt_block_kernel(%arg0: i32, %arg1: memref<8x128xf32, #tpu.memory_space<vmem>>, %arg2: memref<1x128xf32, #tpu.memory_space<vmem>>, %arg3: memref<1x128xf32, #tpu.memory_space<vmem>>, %arg4: memref<128x128xbf16, #tpu.memory_space<vmem>>, %arg5: memref<1x128xf32, #tpu.memory_space<vmem>>, %arg6: memref<1x128xf32, #tpu.memory_space<vmem>>, %arg7: memref<1x128xf32, #tpu.memory_space<vmem>>, %arg8: memref<128x128xbf16, #tpu.memory_space<vmem>>, %arg9: memref<1x128xf32, #tpu.memory_space<vmem>>, %arg10: memref<128x128xbf16, #tpu.memory_space<vmem>>, %arg11: memref<1x128xf32, #tpu.memory_space<vmem>>, %arg12: memref<8x128xf32, #tpu.memory_space<vmem>>) attributes {dimension_semantics = [#tpu.dimension_semantics<parallel>], iteration_bounds = array<i64: 2>, scalar_prefetch = 0 : i64, scratch_operands = 0 : i64, tpu.core_type = #tpu.core_type<tc>, window_params = [{transform_indices = @transform_0, window_bounds = array<i64: 8, 128>}, {pipeline_mode = #tpu.pipeline_mode<synchronous>, transform_indices = @transform_1, window_bounds = array<i64: 1, 128>}, {pipeline_mode = #tpu.pipeline_mode<synchronous>, transform_indices = @transform_2, window_bounds = array<i64: 1, 128>}, {pipeline_mode = #tpu.pipeline_mode<synchronous>, transform_indices = @transform_3, window_bounds = array<i64: 128, 128>}, {pipeline_mode = #tpu.pipeline_mode<synchronous>, transform_indices = @transform_4, window_bounds = array<i64: 1, 128>}, {pipeline_mode = #tpu.pipeline_mode<synchronous>, transform_indices = @transform_5, window_bounds = array<i64: 1, 128>}, {pipeline_mode = #tpu.pipeline_mode<synchronous>, transform_indices = @transform_6, window_bounds = array<i64: 1, 128>}, {pipeline_mode = #tpu.pipeline_mode<synchronous>, transform_indices = @transform_7, window_bounds = array<i64: 128, 128>}, {pipeline_mode = #tpu.pipeline_mode<synchronous>, transform_indices = @transform_8, window_bounds = array<i64: 1, 128>}, {pipeline_mode = #tpu.pipeline_mode<synchronous>, transform_indices = @transform_9, window_bounds = array<i64: 128, 128>}, {pipeline_mode = #tpu.pipeline_mode<synchronous>, transform_indices = @transform_10, window_bounds = array<i64: 1, 128>}, {transform_indices = @transform_11, window_bounds = array<i64: 8, 128>}]} {
    %c0 = arith.constant 0 : index
    %c0_0 = arith.constant 0 : index
    %0 = vector.load %arg1[%c0, %c0_0] : memref<8x128xf32, #tpu.memory_space<vmem>>, vector<8x128xf32>
    %c0_1 = arith.constant 0 : index
    %c0_2 = arith.constant 0 : index
    %1 = vector.load %arg2[%c0_1, %c0_2] : memref<1x128xf32, #tpu.memory_space<vmem>>, vector<1x128xf32>
    %c0_3 = arith.constant 0 : index
    %c0_4 = arith.constant 0 : index
    %2 = vector.load %arg3[%c0_3, %c0_4] : memref<1x128xf32, #tpu.memory_space<vmem>>, vector<1x128xf32>
    %cst = arith.constant dense<0.000000e+00> : vector<8xf32>
    %3 = vector.multi_reduction <add>, %0, %cst [1] : vector<8x128xf32> to vector<8xf32>
    %4 = vector.shape_cast %3 : vector<8xf32> to vector<8x1xf32>
    %cst_5 = arith.constant 3.125000e-02 : f32
    %5 = vector.broadcast %cst_5 : f32 to vector<8x1xf32>
    %6 = arith.mulf %4, %5 : vector<8x1xf32>
    %7 = vector.broadcast %6 : vector<8x1xf32> to vector<8x128xf32>
    %8 = arith.subf %0, %7 : vector<8x128xf32>
    %9 = arith.mulf %8, %8 : vector<8x128xf32>
    %10 = tpu.iota {dimensions = array<i32: 1>} : vector<8x128xi32>
    %c32_i32 = arith.constant 32 : i32
    %11 = vector.broadcast %c32_i32 : i32 to vector<8x128xi32>
    %12 = arith.cmpi slt, %10, %11 : vector<8x128xi32>
    %cst_6 = arith.constant 0.000000e+00 : f32
    %13 = vector.broadcast %cst_6 : f32 to vector<8x128xf32>
    %14 = arith.select %12, %9, %13 : vector<8x128xi1>, vector<8x128xf32>
    %cst_7 = arith.constant dense<0.000000e+00> : vector<8xf32>
    %15 = vector.multi_reduction <add>, %14, %cst_7 [1] : vector<8x128xf32> to vector<8xf32>
    %16 = vector.shape_cast %15 : vector<8xf32> to vector<8x1xf32>
    %cst_8 = arith.constant 3.125000e-02 : f32
    %17 = vector.broadcast %cst_8 : f32 to vector<8x1xf32>
    %18 = arith.mulf %16, %17 : vector<8x1xf32>
    %cst_9 = arith.constant 9.99999974E-6 : f32
    %19 = vector.broadcast %cst_9 : f32 to vector<8x1xf32>
    %20 = arith.addf %18, %19 : vector<8x1xf32>
    %21 = math.rsqrt %20 : vector<8x1xf32>
    %22 = vector.broadcast %21 : vector<8x1xf32> to vector<8x128xf32>
    %23 = arith.mulf %8, %22 : vector<8x128xf32>
    %24 = vector.broadcast %1 : vector<1x128xf32> to vector<8x128xf32>
    %25 = arith.mulf %23, %24 : vector<8x128xf32>
    %26 = vector.broadcast %2 : vector<1x128xf32> to vector<8x128xf32>
    %27 = arith.addf %25, %26 : vector<8x128xf32>
    %28 = arith.truncf %27 : vector<8x128xf32> to vector<8x128xbf16>
    %c0_10 = arith.constant 0 : index
    %c0_11 = arith.constant 0 : index
    %29 = vector.load %arg4[%c0_10, %c0_11] : memref<128x128xbf16, #tpu.memory_space<vmem>>, vector<128x128xbf16>
    %cst_12 = arith.constant dense<0.000000e+00> : vector<8x128xf32>
    %30 = tpu.matmul %28, %29, %cst_12 {dimension_numbers = #tpu.dot_dimension_numbers<[1], [0], [0], [1], [0, 0, 1, 1], [], []>} : vector<8x128xbf16>, vector<128x128xbf16>, vector<8x128xf32> -> vector<8x128xf32>
    %c0_13 = arith.constant 0 : index
    %c0_14 = arith.constant 0 : index
    %31 = vector.load %arg5[%c0_13, %c0_14] : memref<1x128xf32, #tpu.memory_space<vmem>>, vector<1x128xf32>
    %32 = vector.broadcast %31 : vector<1x128xf32> to vector<8x128xf32>
    %33 = arith.addf %30, %32 : vector<8x128xf32>
    %34 = arith.addf %0, %33 : vector<8x128xf32>
    %c0_15 = arith.constant 0 : index
    %c0_16 = arith.constant 0 : index
    %35 = vector.load %arg6[%c0_15, %c0_16] : memref<1x128xf32, #tpu.memory_space<vmem>>, vector<1x128xf32>
    %c0_17 = arith.constant 0 : index
    %c0_18 = arith.constant 0 : index
    %36 = vector.load %arg7[%c0_17, %c0_18] : memref<1x128xf32, #tpu.memory_space<vmem>>, vector<1x128xf32>
    %cst_19 = arith.constant dense<0.000000e+00> : vector<8xf32>
    %37 = vector.multi_reduction <add>, %34, %cst_19 [1] : vector<8x128xf32> to vector<8xf32>
    %38 = vector.shape_cast %37 : vector<8xf32> to vector<8x1xf32>
    %cst_20 = arith.constant 3.125000e-02 : f32
    %39 = vector.broadcast %cst_20 : f32 to vector<8x1xf32>
    %40 = arith.mulf %38, %39 : vector<8x1xf32>
    %41 = vector.broadcast %40 : vector<8x1xf32> to vector<8x128xf32>
    %42 = arith.subf %34, %41 : vector<8x128xf32>
    %43 = arith.mulf %42, %42 : vector<8x128xf32>
    %44 = tpu.iota {dimensions = array<i32: 1>} : vector<8x128xi32>
    %c32_i32_21 = arith.constant 32 : i32
    %45 = vector.broadcast %c32_i32_21 : i32 to vector<8x128xi32>
    %46 = arith.cmpi slt, %44, %45 : vector<8x128xi32>
    %cst_22 = arith.constant 0.000000e+00 : f32
    %47 = vector.broadcast %cst_22 : f32 to vector<8x128xf32>
    %48 = arith.select %46, %43, %47 : vector<8x128xi1>, vector<8x128xf32>
    %cst_23 = arith.constant dense<0.000000e+00> : vector<8xf32>
    %49 = vector.multi_reduction <add>, %48, %cst_23 [1] : vector<8x128xf32> to vector<8xf32>
    %50 = vector.shape_cast %49 : vector<8xf32> to vector<8x1xf32>
    %cst_24 = arith.constant 3.125000e-02 : f32
    %51 = vector.broadcast %cst_24 : f32 to vector<8x1xf32>
    %52 = arith.mulf %50, %51 : vector<8x1xf32>
    %cst_25 = arith.constant 9.99999974E-6 : f32
    %53 = vector.broadcast %cst_25 : f32 to vector<8x1xf32>
    %54 = arith.addf %52, %53 : vector<8x1xf32>
    %55 = math.rsqrt %54 : vector<8x1xf32>
    %56 = vector.broadcast %55 : vector<8x1xf32> to vector<8x128xf32>
    %57 = arith.mulf %42, %56 : vector<8x128xf32>
    %58 = vector.broadcast %35 : vector<1x128xf32> to vector<8x128xf32>
    %59 = arith.mulf %57, %58 : vector<8x128xf32>
    %60 = vector.broadcast %36 : vector<1x128xf32> to vector<8x128xf32>
    %61 = arith.addf %59, %60 : vector<8x128xf32>
    %62 = arith.truncf %61 : vector<8x128xf32> to vector<8x128xbf16>
    %cst_26 = arith.constant 0.000000e+00 : f32
    %63 = vector.broadcast %cst_26 : f32 to vector<8x128xf32>
    %c0_27 = arith.constant 0 : index
    %c0_28 = arith.constant 0 : index
    %64 = vector.load %arg8[%c0_27, %c0_28] : memref<128x128xbf16, #tpu.memory_space<vmem>>, vector<128x128xbf16>
    %cst_29 = arith.constant dense<0.000000e+00> : vector<8x128xf32>
    %65 = tpu.matmul %62, %64, %cst_29 {dimension_numbers = #tpu.dot_dimension_numbers<[1], [0], [0], [1], [0, 0, 1, 1], [], []>} : vector<8x128xbf16>, vector<128x128xbf16>, vector<8x128xf32> -> vector<8x128xf32>
    %c0_30 = arith.constant 0 : index
    %c0_31 = arith.constant 0 : index
    %66 = vector.load %arg9[%c0_30, %c0_31] : memref<1x128xf32, #tpu.memory_space<vmem>>, vector<1x128xf32>
    %67 = vector.broadcast %66 : vector<1x128xf32> to vector<8x128xf32>
    %68 = arith.addf %65, %67 : vector<8x128xf32>
    %cst_32 = arith.constant 5.000000e-01 : f32
    %69 = vector.broadcast %cst_32 : f32 to vector<8x128xf32>
    %70 = arith.mulf %69, %68 : vector<8x128xf32>
    %cst_33 = arith.constant 0.707106769 : f32
    %71 = vector.broadcast %cst_33 : f32 to vector<8x128xf32>
    %72 = arith.mulf %68, %71 : vector<8x128xf32>
    %73 = math.erf %72 : vector<8x128xf32>
    %cst_34 = arith.constant 1.000000e+00 : f32
    %74 = vector.broadcast %cst_34 : f32 to vector<8x128xf32>
    %75 = arith.addf %74, %73 : vector<8x128xf32>
    %76 = arith.mulf %70, %75 : vector<8x128xf32>
    %77 = arith.truncf %76 : vector<8x128xf32> to vector<8x128xbf16>
    %c0_35 = arith.constant 0 : index
    %c0_36 = arith.constant 0 : index
    %78 = vector.load %arg10[%c0_35, %c0_36] : memref<128x128xbf16, #tpu.memory_space<vmem>>, vector<128x128xbf16>
    %cst_37 = arith.constant dense<0.000000e+00> : vector<8x128xf32>
    %79 = tpu.matmul %77, %78, %cst_37 {dimension_numbers = #tpu.dot_dimension_numbers<[1], [0], [0], [1], [0, 0, 1, 1], [], []>} : vector<8x128xbf16>, vector<128x128xbf16>, vector<8x128xf32> -> vector<8x128xf32>
    %80 = arith.addf %63, %79 : vector<8x128xf32>
    %81 = arith.addf %34, %80 : vector<8x128xf32>
    %c0_38 = arith.constant 0 : index
    %c0_39 = arith.constant 0 : index
    %82 = vector.load %arg11[%c0_38, %c0_39] : memref<1x128xf32, #tpu.memory_space<vmem>>, vector<1x128xf32>
    %83 = vector.broadcast %82 : vector<1x128xf32> to vector<8x128xf32>
    %84 = arith.addf %81, %83 : vector<8x128xf32>
    %c0_40 = arith.constant 0 : index
    %c0_41 = arith.constant 0 : index
    %85 = vector.load %arg12[%c0_40, %c0_41] : memref<8x128xf32, #tpu.memory_space<vmem>>, vector<8x128xf32>
    tpu.vector_store %arg12[%c0_40, %c0_41], %84 {strides = array<i32>} : memref<8x128xf32, #tpu.memory_space<vmem>>, vector<8x128xf32>,
    return
  }
  func.func @transform_0(%arg0: i32) -> (i32, i32) {
    %c0_i32 = arith.constant 0 : i32
    %c0_i32_0 = arith.constant 0 : i32
    return %arg0, %c0_i32 : i32, i32
  }
  func.func @transform_1(%arg0: i32) -> (i32, i32) {
    %c0_i32 = arith.constant 0 : i32
    %c0_i32_0 = arith.constant 0 : i32
    %c0_i32_1 = arith.constant 0 : i32
    return %c0_i32, %c0_i32_0 : i32, i32
  }
  func.func @transform_2(%arg0: i32) -> (i32, i32) {
    %c0_i32 = arith.constant 0 : i32
    %c0_i32_0 = arith.constant 0 : i32
    %c0_i32_1 = arith.constant 0 : i32
    return %c0_i32, %c0_i32_0 : i32, i32
  }
  func.func @transform_3(%arg0: i32) -> (i32, i32) {
    %c0_i32 = arith.constant 0 : i32
    %c0_i32_0 = arith.constant 0 : i32
    %c0_i32_1 = arith.constant 0 : i32
    return %c0_i32, %c0_i32_0 : i32, i32
  }
  func.func @transform_4(%arg0: i32) -> (i32, i32) {
    %c0_i32 = arith.constant 0 : i32
    %c0_i32_0 = arith.constant 0 : i32
    %c0_i32_1 = arith.constant 0 : i32
    return %c0_i32, %c0_i32_0 : i32, i32
  }
  func.func @transform_5(%arg0: i32) -> (i32, i32) {
    %c0_i32 = arith.constant 0 : i32
    %c0_i32_0 = arith.constant 0 : i32
    %c0_i32_1 = arith.constant 0 : i32
    return %c0_i32, %c0_i32_0 : i32, i32
  }
  func.func @transform_6(%arg0: i32) -> (i32, i32) {
    %c0_i32 = arith.constant 0 : i32
    %c0_i32_0 = arith.constant 0 : i32
    %c0_i32_1 = arith.constant 0 : i32
    return %c0_i32, %c0_i32_0 : i32, i32
  }
  func.func @transform_7(%arg0: i32) -> (i32, i32) {
    %c0_i32 = arith.constant 0 : i32
    %c0_i32_0 = arith.constant 0 : i32
    %c0_i32_1 = arith.constant 0 : i32
    return %c0_i32, %c0_i32_0 : i32, i32
  }
  func.func @transform_8(%arg0: i32) -> (i32, i32) {
    %c0_i32 = arith.constant 0 : i32
    %c0_i32_0 = arith.constant 0 : i32
    %c0_i32_1 = arith.constant 0 : i32
    return %c0_i32, %c0_i32_0 : i32, i32
  }
  func.func @transform_9(%arg0: i32) -> (i32, i32) {
    %c0_i32 = arith.constant 0 : i32
    %c0_i32_0 = arith.constant 0 : i32
    %c0_i32_1 = arith.constant 0 : i32
    return %c0_i32, %c0_i32_0 : i32, i32
  }
  func.func @transform_10(%arg0: i32) -> (i32, i32) {
    %c0_i32 = arith.constant 0 : i32
    %c0_i32_0 = arith.constant 0 : i32
    %c0_i32_1 = arith.constant 0 : i32
    return %c0_i32, %c0_i32_0 : i32, i32
  }
  func.func @transform_11(%arg0: i32) -> (i32, i32) {
    %c0_i32 = arith.constant 0 : i32
    %c0_i32_0 = arith.constant 0 : i32
    return %arg0, %c0_i32 : i32, i32
  }
}

module attributes {stable_mosaic.version = 11 : i64} {
  func.func @gpt_block_kernel(%arg0: i32, %arg1: memref<8x128xf32, #tpu.memory_space<vmem>>, %arg2: memref<1x128xf32, #tpu.memory_space<vmem>>, %arg3: memref<1x128xf32, #tpu.memory_space<vmem>>, %arg4: memref<128x128xbf16, #tpu.memory_space<vmem>>, %arg5: memref<1x128xf32, #tpu.memory_space<vmem>>, %arg6: memref<1x128xf32, #tpu.memory_space<vmem>>, %arg7: memref<1x128xf32, #tpu.memory_space<vmem>>, %arg8: memref<128x128xbf16, #tpu.memory_space<vmem>>, %arg9: memref<1x128xf32, #tpu.memory_space<vmem>>, %arg10: memref<128x128xbf16, #tpu.memory_space<vmem>>, %arg11: memref<1x128xf32, #tpu.memory_space<vmem>>, %arg12: memref<8x128xf32, #tpu.memory_space<vmem>>) attributes {dimension_semantics = [#tpu.dimension_semantics<parallel>], iteration_bounds = array<i64: 2>, scalar_prefetch = 0 : i64, scratch_operands = 0 : i64, tpu.core_type = #tpu.core_type<tc>, window_params = [{transform_indices = @transform_0, window_bounds = array<i64: 8, 128>}, {pipeline_mode = #tpu.pipeline_mode<synchronous>, transform_indices = @transform_1, window_bounds = array<i64: 1, 128>}, {pipeline_mode = #tpu.pipeline_mode<synchronous>, transform_indices = @transform_2, window_bounds = array<i64: 1, 128>}, {pipeline_mode = #tpu.pipeline_mode<synchronous>, transform_indices = @transform_3, window_bounds = array<i64: 128, 128>}, {pipeline_mode = #tpu.pipeline_mode<synchronous>, transform_indices = @transform_4, window_bounds = array<i64: 1, 128>}, {pipeline_mode = #tpu.pipeline_mode<synchronous>, transform_indices = @transform_5, window_bounds = array<i64: 1, 128>}, {pipeline_mode = #tpu.pipeline_mode<synchronous>, transform_indices = @transform_6, window_bounds = array<i64: 1, 128>}, {pipeline_mode = #tpu.pipeline_mode<synchronous>, transform_indices = @transform_7, window_bounds = array<i64: 128, 128>}, {pipeline_mode = #tpu.pipeline_mode<synchronous>, transform_indices = @transform_8, window_bounds = array<i64: 1, 128>}, {pipeline_mode = #tpu.pipeline_mode<synchronous>, transform_indices = @transform_9, window_bounds = array<i64: 128, 128>}, {pipeline_mode = #tpu.pipeline_mode<synchronous>, transform_indices = @transform_10, window_bounds = array<i64: 1, 128>}, {transform_indices = @transform_11, window_bounds = array<i64: 8, 128>}]} {
    %c0 = arith.constant 0 : index
    %c0_0 = arith.constant 0 : index
    %0 = vector.load %arg1[%c0, %c0_0] : memref<8x128xf32, #tpu.memory_space<vmem>>, vector<8x128xf32>
    %c0_1 = arith.constant 0 : index
    %c0_2 = arith.constant 0 : index
    %1 = vector.load %arg2[%c0_1, %c0_2] : memref<1x128xf32, #tpu.memory_space<vmem>>, vector<1x128xf32>
    %c0_3 = arith.constant 0 : index
    %c0_4 = arith.constant 0 : index
    %2 = vector.load %arg3[%c0_3, %c0_4] : memref<1x128xf32, #tpu.memory_space<vmem>>, vector<1x128xf32>
    %cst = arith.constant dense<0.000000e+00> : vector<8xf32>
    %3 = vector.multi_reduction <add>, %0, %cst [1] : vector<8x128xf32> to vector<8xf32>
    %4 = vector.shape_cast %3 : vector<8xf32> to vector<8x1xf32>
    %cst_5 = arith.constant 3.125000e-02 : f32
    %5 = vector.broadcast %cst_5 : f32 to vector<8x1xf32>
    %6 = arith.mulf %4, %5 : vector<8x1xf32>
    %7 = vector.broadcast %6 : vector<8x1xf32> to vector<8x128xf32>
    %8 = arith.subf %0, %7 : vector<8x128xf32>
    %9 = arith.mulf %8, %8 : vector<8x128xf32>
    %10 = tpu.iota {dimensions = array<i32: 1>} : vector<8x128xi32>
    %c32_i32 = arith.constant 32 : i32
    %11 = vector.broadcast %c32_i32 : i32 to vector<8x128xi32>
    %12 = arith.cmpi slt, %10, %11 : vector<8x128xi32>
    %cst_6 = arith.constant 0.000000e+00 : f32
    %13 = vector.broadcast %cst_6 : f32 to vector<8x128xf32>
    %14 = arith.select %12, %9, %13 : vector<8x128xi1>, vector<8x128xf32>
    %cst_7 = arith.constant dense<0.000000e+00> : vector<8xf32>
    %15 = vector.multi_reduction <add>, %14, %cst_7 [1] : vector<8x128xf32> to vector<8xf32>
    %16 = vector.shape_cast %15 : vector<8xf32> to vector<8x1xf32>
    %cst_8 = arith.constant 3.125000e-02 : f32
    %17 = vector.broadcast %cst_8 : f32 to vector<8x1xf32>
    %18 = arith.mulf %16, %17 : vector<8x1xf32>
    %cst_9 = arith.constant 9.99999974E-6 : f32
    %19 = vector.broadcast %cst_9 : f32 to vector<8x1xf32>
    %20 = arith.addf %18, %19 : vector<8x1xf32>
    %21 = math.rsqrt %20 : vector<8x1xf32>
    %22 = vector.broadcast %21 : vector<8x1xf32> to vector<8x128xf32>
    %23 = arith.mulf %8, %22 : vector<8x128xf32>
    %24 = vector.broadcast %1 : vector<1x128xf32> to vector<8x128xf32>
    %25 = arith.mulf %23, %24 : vector<8x128xf32>
    %26 = vector.broadcast %2 : vector<1x128xf32> to vector<8x128xf32>
    %27 = arith.addf %25, %26 : vector<8x128xf32>
    %28 = arith.truncf %27 : vector<8x128xf32> to vector<8x128xbf16>
    %c0_10 = arith.constant 0 : index
    %c0_11 = arith.constant 0 : index
    %29 = vector.load %arg4[%c0_10, %c0_11] : memref<128x128xbf16, #tpu.memory_space<vmem>>, vector<128x128xbf16>
    %cst_12 = arith.constant dense<0.000000e+00> : vector<8x128xf32>
    %30 = tpu.matmul %28, %29, %cst_12 {dimension_numbers = #tpu.dot_dimension_numbers<[1], [0], [0], [1], [0, 0, 1, 1], [], []>} : vector<8x128xbf16>, vector<128x128xbf16>, vector<8x128xf32> -> vector<8x128xf32>
    %c0_13 = arith.constant 0 : index
    %c0_14 = arith.constant 0 : index
    %31 = vector.load %arg5[%c0_13, %c0_14] : memref<1x128xf32, #tpu.memory_space<vmem>>, vector<1x128xf32>
    %32 = vector.broadcast %31 : vector<1x128xf32> to vector<8x128xf32>
    %33 = arith.addf %30, %32 : vector<8x128xf32>
    %34 = arith.addf %0, %33 : vector<8x128xf32>
    %c0_15 = arith.constant 0 : index
    %c0_16 = arith.constant 0 : index
    %35 = vector.load %arg6[%c0_15, %c0_16] : memref<1x128xf32, #tpu.memory_space<vmem>>, vector<1x128xf32>
    %c0_17 = arith.constant 0 : index
    %c0_18 = arith.constant 0 : index
    %36 = vector.load %arg7[%c0_17, %c0_18] : memref<1x128xf32, #tpu.memory_space<vmem>>, vector<1x128xf32>
    %cst_19 = arith.constant dense<0.000000e+00> : vector<8xf32>
    %37 = vector.multi_reduction <add>, %34, %cst_19 [1] : vector<8x128xf32> to vector<8xf32>
    %38 = vector.shape_cast %37 : vector<8xf32> to vector<8x1xf32>
    %cst_20 = arith.constant 3.125000e-02 : f32
    %39 = vector.broadcast %cst_20 : f32 to vector<8x1xf32>
    %40 = arith.mulf %38, %39 : vector<8x1xf32>
    %41 = vector.broadcast %40 : vector<8x1xf32> to vector<8x128xf32>
    %42 = arith.subf %34, %41 : vector<8x128xf32>
    %43 = arith.mulf %42, %42 : vector<8x128xf32>
    %44 = tpu.iota {dimensions = array<i32: 1>} : vector<8x128xi32>
    %c32_i32_21 = arith.constant 32 : i32
    %45 = vector.broadcast %c32_i32_21 : i32 to vector<8x128xi32>
    %46 = arith.cmpi slt, %44, %45 : vector<8x128xi32>
    %cst_22 = arith.constant 0.000000e+00 : f32
    %47 = vector.broadcast %cst_22 : f32 to vector<8x128xf32>
    %48 = arith.select %46, %43, %47 : vector<8x128xi1>, vector<8x128xf32>
    %cst_23 = arith.constant dense<0.000000e+00> : vector<8xf32>
    %49 = vector.multi_reduction <add>, %48, %cst_23 [1] : vector<8x128xf32> to vector<8xf32>
    %50 = vector.shape_cast %49 : vector<8xf32> to vector<8x1xf32>
    %cst_24 = arith.constant 3.125000e-02 : f32
    %51 = vector.broadcast %cst_24 : f32 to vector<8x1xf32>
    %52 = arith.mulf %50, %51 : vector<8x1xf32>
    %cst_25 = arith.constant 9.99999974E-6 : f32
    %53 = vector.broadcast %cst_25 : f32 to vector<8x1xf32>
    %54 = arith.addf %52, %53 : vector<8x1xf32>
    %55 = math.rsqrt %54 : vector<8x1xf32>
    %56 = vector.broadcast %55 : vector<8x1xf32> to vector<8x128xf32>
    %57 = arith.mulf %42, %56 : vector<8x128xf32>
    %58 = vector.broadcast %35 : vector<1x128xf32> to vector<8x128xf32>
    %59 = arith.mulf %57, %58 : vector<8x128xf32>
    %60 = vector.broadcast %36 : vector<1x128xf32> to vector<8x128xf32>
    %61 = arith.addf %59, %60 : vector<8x128xf32>
    %62 = arith.truncf %61 : vector<8x128xf32> to vector<8x128xbf16>
    %cst_26 = arith.constant 0.000000e+00 : f32
    %63 = vector.broadcast %cst_26 : f32 to vector<8x128xf32>
    %c0_27 = arith.constant 0 : index
    %c0_28 = arith.constant 0 : index
    %64 = vector.load %arg8[%c0_27, %c0_28] : memref<128x128xbf16, #tpu.memory_space<vmem>>, vector<128x128xbf16>
    %cst_29 = arith.constant dense<0.000000e+00> : vector<8x128xf32>
    %65 = tpu.matmul %62, %64, %cst_29 {dimension_numbers = #tpu.dot_dimension_numbers<[1], [0], [0], [1], [0, 0, 1, 1], [], []>} : vector<8x128xbf16>, vector<128x128xbf16>, vector<8x128xf32> -> vector<8x128xf32>
    %c0_30 = arith.constant 0 : index
    %c0_31 = arith.constant 0 : index
    %66 = vector.load %arg9[%c0_30, %c0_31] : memref<1x128xf32, #tpu.memory_space<vmem>>, vector<1x128xf32>
    %67 = vector.broadcast %66 : vector<1x128xf32> to vector<8x128xf32>
    %68 = arith.addf %65, %67 : vector<8x128xf32>
    %cst_32 = arith.constant 5.000000e-01 : f32
    %69 = vector.broadcast %cst_32 : f32 to vector<8x128xf32>
    %70 = arith.mulf %69, %68 : vector<8x128xf32>
    %cst_33 = arith.constant 0.707106769 : f32
    %71 = vector.broadcast %cst_33 : f32 to vector<8x128xf32>
    %72 = arith.mulf %68, %71 : vector<8x128xf32>
    %73 = math.erf %72 : vector<8x128xf32>
    %cst_34 = arith.constant 1.000000e+00 : f32
    %74 = vector.broadcast %cst_34 : f32 to vector<8x128xf32>
    %75 = arith.addf %74, %73 : vector<8x128xf32>
    %76 = arith.mulf %70, %75 : vector<8x128xf32>
    %77 = arith.truncf %76 : vector<8x128xf32> to vector<8x128xbf16>
    %c0_35 = arith.constant 0 : index
    %c0_36 = arith.constant 0 : index
    %78 = vector.load %arg10[%c0_35, %c0_36] : memref<128x128xbf16, #tpu.memory_space<vmem>>, vector<128x128xbf16>
    %cst_37 = arith.constant dense<0.000000e+00> : vector<8x128xf32>
    %79 = tpu.matmul %77, %78, %cst_37 {dimension_numbers = #tpu.dot_dimension_numbers<[1], [0], [0], [1], [0, 0, 1, 1], [], []>} : vector<8x128xbf16>, vector<128x128xbf16>, vector<8x128xf32> -> vector<8x128xf32>
    %80 = arith.addf %63, %79 : vector<8x128xf32>
    %81 = arith.addf %34, %80 : vector<8x128xf32>
    %c0_38 = arith.constant 0 : index
    %c0_39 = arith.constant 0 : index
    %82 = vector.load %arg11[%c0_38, %c0_39] : memref<1x128xf32, #tpu.memory_space<vmem>>, vector<1x128xf32>
    %83 = vector.broadcast %82 : vector<1x128xf32> to vector<8x128xf32>
    %84 = arith.addf %81, %83 : vector<8x128xf32>
    %c0_40 = arith.constant 0 : index
    %c0_41 = arith.constant 0 : index
    %85 = vector.load %arg12[%c0_40, %c0_41] : memref<8x128xf32, #tpu.memory_space<vmem>>, vector<8x128xf32>
    tpu.vector_store %arg12[%c0_40, %c0_41], %84 {strides = array<i32>} : memref<8x128xf32, #tpu.memory_space<vmem>>, vector<8x128xf32>,
    return
  }
  func.func @transform_0(%arg0: i32) -> (i32, i32) {
    %c0_i32 = arith.constant 0 : i32
    %c0_i32_0 = arith.constant 0 : i32
    return %arg0, %c0_i32 : i32, i32
  }
  func.func @transform_1(%arg0: i32) -> (i32, i32) {
    %c0_i32 = arith.constant 0 : i32
    %c0_i32_0 = arith.constant 0 : i32
    %c0_i32_1 = arith.constant 0 : i32
    return %c0_i32, %c0_i32_0 : i32, i32
  }
  func.func @transform_2(%arg0: i32) -> (i32, i32) {
    %c0_i32 = arith.constant 0 : i32
    %c0_i32_0 = arith.constant 0 : i32
    %c0_i32_1 = arith.constant 0 : i32
    return %c0_i32, %c0_i32_0 : i32, i32
  }
  func.func @transform_3(%arg0: i32) -> (i32, i32) {
    %c0_i32 = arith.constant 0 : i32
    %c0_i32_0 = arith.constant 0 : i32
    %c0_i32_1 = arith.constant 0 : i32
    return %c0_i32, %c0_i32_0 : i32, i32
  }
  func.func @transform_4(%arg0: i32) -> (i32, i32) {
    %c0_i32 = arith.constant 0 : i32
    %c0_i32_0 = arith.constant 0 : i32
    %c0_i32_1 = arith.constant 0 : i32
    return %c0_i32, %c0_i32_0 : i32, i32
  }
  func.func @transform_5(%arg0: i32) -> (i32, i32) {
    %c0_i32 = arith.constant 0 : i32
    %c0_i32_0 = arith.constant 0 : i32
    %c0_i32_1 = arith.constant 0 : i32
    return %c0_i32, %c0_i32_0 : i32, i32
  }
  func.func @transform_6(%arg0: i32) -> (i32, i32) {
    %c0_i32 = arith.constant 0 : i32
    %c0_i32_0 = arith.constant 0 : i32
    %c0_i32_1 = arith.constant 0 : i32
    return %c0_i32, %c0_i32_0 : i32, i32
  }
  func.func @transform_7(%arg0: i32) -> (i32, i32) {
    %c0_i32 = arith.constant 0 : i32
    %c0_i32_0 = arith.constant 0 : i32
    %c0_i32_1 = arith.constant 0 : i32
    return %c0_i32, %c0_i32_0 : i32, i32
  }
  func.func @transform_8(%arg0: i32) -> (i32, i32) {
    %c0_i32 = arith.constant 0 : i32
    %c0_i32_0 = arith.constant 0 : i32
    %c0_i32_1 = arith.constant 0 : i32
    return %c0_i32, %c0_i32_0 : i32, i32
  }
  func.func @transform_9(%arg0: i32) -> (i32, i32) {
    %c0_i32 = arith.constant 0 : i32
    %c0_i32_0 = arith.constant 0 : i32
    %c0_i32_1 = arith.constant 0 : i32
    return %c0_i32, %c0_i32_0 : i32, i32
  }
  func.func @transform_10(%arg0: i32) -> (i32, i32) {
    %c0_i32 = arith.constant 0 : i32
    %c0_i32_0 = arith.constant 0 : i32
    %c0_i32_1 = arith.constant 0 : i32
    return %c0_i32, %c0_i32_0 : i32, i32
  }
  func.func @transform_11(%arg0: i32) -> (i32, i32) {
    %c0_i32 = arith.constant 0 : i32
    %c0_i32_0 = arith.constant 0 : i32
    return %arg0, %c0_i32 : i32, i32
  }
}

</mosaic_0001>

<bundles_post_ra>
// kernel: tpu_custom_call.1
= control target key start
LH: loop header
LB: loop body
LE: loop exit
PB: predicated region body
PF: predicated region fallthrough
CT: control target
= control target key end

     0   :  { %s1683_s0 = inlined_call_operand.hbm [shape: f32[16,128], index: 0, kind: input, shape index: {}]   ;;  %s1684_s1 = inlined_call_operand.hbm [shape: f32[1,128], index: 1, kind: input, shape index: {}]   ;;  %s1685_s2 = inlined_call_operand.vmem [shape: f32[1,128], index: 2, kind: input, shape index: {}]   ;;  %s1686_s3 = inlined_call_operand.hbm [shape: bf16[128,128], index: 3, kind: input, shape index: {}]   ;;  %s1687_s4 = inlined_call_operand.vmem [shape: f32[1,128], index: 4, kind: input, shape index: {}]   ;;  %s1688_s5 = inlined_call_operand.vmem [shape: f32[1,128], index: 5, kind: input, shape index: {}]   ;;  %s1689_s6 = inlined_call_operand.vmem [shape: f32[1,128], index: 6, kind: input, shape index: {}]   ;;  %s1690_s7 = inlined_call_operand.hbm [shape: bf16[128,128], index: 7, kind: input, shape index: {}]   ;;  %s1691_s8 = inlined_call_operand.vmem [shape: f32[1,128], index: 8, kind: input, shape index: {}]   ;;  %s1692_s9 = inlined_call_operand.hbm [shape: bf16[128,128], index: 9, kind: input, shape index: {}]   ;;  %s1693_s10 = inlined_call_operand.vmem [shape: f32[1,128], index: 10, kind: input, shape index: {}]   ;;  %s1694_s11 = inlined_call_operand.hbm [shape: f32[16,128], index: 11, kind: output, shape index: {}]  }
   0x1   :  { %1696 = sst [smem:[#allocation18_spill]] %s1684_s1 }
   0x2   :  { %1697 = sst [smem:[#allocation19_spill]] %s1686_s3 }
   0x3   :  { %1698 = sst [smem:[#allocation20_spill]] %s1690_s7 }
   0x4   :  { %1699 = sst [smem:[#allocation21_spill]] %s1692_s9 }
   0x5   :  { %16 = vsyncpa [#allocation3], 0 }
   0x6   :  { %18 = vsyncpa [#allocation3 + $0x1], 0 }
   0x7   :  { %19 = vsyncpa [#allocation6], 0 }
   0x8   :  { %20 = vsyncpa [#allocation9], 0 }
   0x9   :  { %21 = vsyncpa [#allocation4], 0 }
   0xa   :  { %23 = vsyncpa [#allocation4 + $0x1], 0  ;;  %s1487_s17 = smov 0   ;;  %s1489_s18 = smov 0  }
   0xb   :  { %s1491_s19 = smov 0   ;;  %s1493_s20 = smov 0  }
   0xc LB: > { %1700 = sst [smem:[#allocation16_spill]] %s1415_s19  ;;  %s1511_s24 = sadd.s32 4294967295, %s1419_s20   ;;  %s1419_s20 = sphi %s1493_s20, %s1718_s20   ;;  %s1415_s19 = sphi %s1491_s19, %s1715_s19   ;;  %s1411_s18 = sphi %s1489_s18, %s1717_s18   ;;  %s1407_s17 = sphi %s1487_s17, %s1716_s17  }
   0xd   : > { %s1701_s1 = sld [smem:[#allocation18_spill]]  ;;  %p953_p0 = scmp.ge.s32.totalorder %s1419_s20, 1 }
   0xe   : > { %p50_p1 = scmp.eq.s32.totalorder %s1511_s24, 0  ;;  %p296_p2 = scmp.lt.s32.totalorder %s1419_s20, 3 }
   0xf   : > { %s1421_s26 = smov [#allocation5]   ;;  %s1703_s7 = sld [smem:[#allocation20_spill]] }
  0x10   : > { %p1516_p3 = pnand %p953_p0, %p296_p2  ;;  %s310_s27 = sshll.u32 %s1421_s26, 4  ;;  %s311_s27 = int_to_ptr.vmem [resolvable:$true] %s310_s27 }
  0x11   : > { %s1705_s3 = sld [smem:[#allocation19_spill]]  ;;  %s1422_s16 = smov [#allocation8]  }
  0x12   : > { %p1113_p5 = pneg %p1516_p3  ;;  %s347_s21 = sshll.u32 %s1422_s16, 4  ;;  %s348_s21 = int_to_ptr.vmem [resolvable:$true] %s347_s21 }
  0x13   : > { %s308_s23 = sshll.u32 %s1701_s1, 4  ;;  %s1423_s22 = smov 64   ;;  %s309_s23 = int_to_ptr.hbm [resolvable:$true] %s308_s23 }
  0x14   : > { %p1528_p6 = pnand %p1113_p5, %p50_p1  ;;  %s1424_s26 = smov 4  }
  0x15   : > { %s345_s30 = sshll.u32 %s1703_s7, 4  ;;  %s1706_s9 = sld [smem:[#allocation21_spill]]  ;;  %s346_s30 = int_to_ptr.hbm [resolvable:$true] %s345_s30 }
  0x16   : > { %1116 = dma.hbm_to_vmem [thread:$0]  (!%p1528_p6), %s309_s23, 16, %s311_s27, [#allocation6]  }
  0x17   : > { %s322_s15 = sshll.u32 %s1705_s3, 4  ;;  %s1425_s14 = smov [#allocation7]   ;;  %s323_s15 = int_to_ptr.hbm [resolvable:$true] %s322_s15 }
  0x18   : > { %1122 = dma.hbm_to_vmem [thread:$0]  (!%p1528_p6), %s346_s30, 1024, %s348_s21, [#allocation9], %s1423_s22, %s1423_s22, %s1424_s26  }
  0x19   : > { %s324_s23 = sshll.u32 %s1425_s14, 4  ;;  %s1426_s27 = smov [#allocation10]   ;;  %s325_s23 = int_to_ptr.vmem [resolvable:$true] %s324_s23 }
  0x1a   : > { %1119 = dma.hbm_to_vmem [thread:$0]  (!%p1528_p6), %s323_s15, 1024, %s325_s23, [#allocation6], %s1423_s22, %s1423_s22, %s1424_s26  }
  0x1b   : > { %s362_s13 = sshll.u32 %s1706_s9, 4  ;;  %s364_s30 = sshll.u32 %s1426_s27, 4  ;;  %s363_s13 = int_to_ptr.hbm [resolvable:$true] %s362_s13  ;;  %s365_s30 = int_to_ptr.vmem [resolvable:$true] %s364_s30 }
  0x1c   : > { %1125 = dma.hbm_to_vmem [thread:$0]  (!%p1528_p6), %s363_s13, 1024, %s365_s30, [#allocation9], %s1423_s22, %s1423_s22, %s1424_s26  }
  0x1d   : > { %s952_s16 = sadd.s32 4294967294, %s1419_s20   ;;  %s1548_s21 = sadd.s32 1, %s1419_s20  }
  0x1e   : > { %s33_s28 = ssub.s32 %s1419_s20, %s1548_s21  ;;  %s36_s29 = sadd.s32 1, %s1415_s19 }
  0x1f   : > { %p34_p7 = scmp.eq.s32.totalorder %s33_s28, 0  ;;  %p43_p8 = scmp.ne.s32.totalorder %s1415_s19, %s1411_s18 }
  0x20   : > { %p44_p9 = scmp.eq.s32.totalorder %s1419_s20, 0  ;;  %p49_p10 = scmp.ne.s32.totalorder %s1411_s18, %s1407_s17 }
  0x21   : > { %s1559_s15 = scalar_select %p34_p7, %s1415_s19, %s36_s29  }
  0x22   : > { %p1561_p11 = por %p44_p9, %p43_p8  ;;  %p1567_p12 = por %p50_p1, %p49_p10 }
  0x23   : > { %1707 = sst [smem:[#allocation17_spill]] %s1559_s15  ;;  %p283_p13 = scmp.eq.s32.totalorder %s1511_s24, 1 }
  0x24   : > { %p289_p0 = scmp.eq.s32.totalorder %s952_s16, 1  ;;  %p1138_p2 = scmp.lt.s32.totalorder %s1419_s20, 2 }
  0x25   : > { %s381_s22 = sand.u32 1, %s1415_s19   ;;  %p1574_p5 = por %p283_p13, %p43_p8 }
  0x26   : > { %p1578_p6 = por %p289_p0, %p49_p10  ;;  %s959_s23 = sshll.u32 %s381_s22, 3 }
  0x27   : > { %s960_s27 = sshll.u32 %s1419_s20, 3  ;;  %s385_s1 = scalar_lea.vmem [#allocation2], %s959_s23 }
  0x28   : > { %s389_s29 = scalar_lea.hbm %s1683_s0, %s960_s27  ;;  %s393_s3 = sshll.u32 %s385_s1, 4  ;;  %s394_s3 = int_to_ptr.vmem [resolvable:$true] %s393_s3 }
  0x29   : > { %s391_s7 = sshll.u32 %s389_s29, 4  ;;  %p1588_p7 = pnand %p1138_p2, %p1561_p11  ;;  %s392_s7 = int_to_ptr.hbm [resolvable:$true] %s391_s7 }
  0x2a   : > { %s382_s9 = scalar_lea.sflag [#allocation3], %s381_s22  ;;  %s1315_s15 = sshra.s32 %s392_s7, 4  ;;  %s1316_s15 = int_to_ptr.hbm [resolvable:$true] %s1315_s15 }
  0x2b   : > { %s1317_s19 = scalar_lea.hbm %s1316_s15, 8  ;;  %p1319_p9 = pneg %p1588_p7 }
  0x2c   : > { %p1318_p8 = scmp.ne.s32.totalorder %s1316_s15, %s1317_s19  ;;  %s1322_s27 = scalar_lea.hbm %s1683_s0, 16 }
  0x2d   : > { %p1323_p11 = scmp.lt.s32.totalorder %s1316_s15, %s1683_s0  ;;  %p1324_p0 = scmp.lt.s32.totalorder %s1322_s27, %s1317_s19 }
  0x2e   : > { %p1320_p10 = pnand %p1319_p9, %p1318_p8 }
  0x2f   : > { %p1325_p2 = por %p1324_p0, %p1323_p11 }
  0x30   : > { %p1321_p13 = pneg %p1320_p10 }
  0x32   : > { %p1326_p4 = pnand %p1325_p2, %p1321_p13 }
  0x34   : > { %1329 = shalt.err (!%p1326_p4)
}
  0x35   : > { %1129 = dma.hbm_to_vmem [thread:$0]  (!%p1588_p7), %s392_s7, 128, %s394_s3, %s382_s9  }
  0x36   : > { %402 = sbr.rel (%p1516_p3) target bundleno = 1054 (0x41e), region = 64  ;;  %s1605_s22 = sand.u32 (!%p1516_p3), 1, %s1411_s18  }
  0x37   : > { %s962_s28 = sshll.u32 (!%p1516_p3), %s1605_s22, 3  ;;  %s405_s29 = scalar_lea.sflag (!%p1516_p3), [#allocation3], %s1605_s22 }
  0x38   : > { %s408_s19 = scalar_lea.vmem (!%p1516_p3), [#allocation2], %s962_s28 }
  0x3b   : > { %1390 = dma.done.wait (%p1567_p12), %s405_s29, 128  }
  0x3c   : > { %1392 = vsyncadd (%p1567_p12), %s405_s29, 4294967168 }
  0x3d   : > { %1394 = dma.done.wait (%p50_p1), [#allocation6], 1040  }
  0x3e   : > { %1396 = vsyncadd (%p50_p1), [#allocation6], 4294966256 }
  0x3f   : > { %1398 = dma.done.wait (%p50_p1), [#allocation9], 2048  }
  0x40   : > { %1400 = vsyncadd (%p50_p1), [#allocation9], 4294965248  ;;  %v468_v0 = vld [vmem:[%s408_s19] sm:$0xff]  ;;  %v476_v2 = vlaneseq  ;;  %v1073_v11 = vld [vmem:[#allocation7 + $0x20] sm:$0xff]  ;;  %s1066_s30 = sshll.u32 %s1511_s24, 3  ;;  %s467_s9 = scalar_lea.vmem [#allocation11], %s962_s28 }
  0x41   : > { %471 = vadd.xlane.f32.xlu0 %v468_v0  ;;  %v1076_v1 = vld [vmem:[#allocation7 + $0x38] sm:$0xff]  ;;  %v1075_v9 = vld [vmem:[#allocation7 + $0x30] sm:$0xff]  ;;  %v1074_v10 = vld [vmem:[#allocation7 + $0x28] sm:$0xff]  ;;  %s839_s19 = scalar_lea.hbm %s1694_s11, %s1066_s30  ;;  %s841_s25 = sshll.u32 %s467_s9, 4  ;;  %s842_s25 = int_to_ptr.vmem [resolvable:$true] %s841_s25 }
  0x42   : > { %572 = vmatpush.bf16.msra.mxu0 %v1076_v1  ;;  %v477_v4 = vand.u32 127, %v476_v2  ;;  %v1072_v12 = vld [vmem:[#allocation7 + $0x18] sm:$0xff]  ;;  %v1071_v13 = vld [vmem:[#allocation7 + $0x10] sm:$0xff]  ;;  %v1070_v14 = vld [vmem:[#allocation7 + $0x8] sm:$0xff]  ;;  %s843_s15 = sshll.u32 %s839_s19, 4  ;;  %s829_s24 = scalar_lea.sflag [#allocation4], %s1605_s22  ;;  %s844_s15 = int_to_ptr.hbm [resolvable:$true] %s843_s15 }
  0x43   : > { %v1069_v15 = vld [vmem:[#allocation7] sm:$0xff]  ;;  %v1182_v25 = vld [vmem:[#allocation5] ss:$0 sm:$0xff]  ;;  %v1183_v28 = vld [vmem:[%s1685_s2] ss:$0 sm:$0xff]  ;;  %s1359_s12 = sshra.s32 %s844_s15, 4  ;;  %s1360_s12 = int_to_ptr.hbm [resolvable:$true] %s1359_s12 }
  0x44   : > { %vm478_vm0 = vcmp.lt.s32.totalorder %v477_v4, 32  ;;  %v1184_v32 = vld [vmem:[%s1687_s4] ss:$0 sm:$0xff]  ;;  %v1084_v37 = vld [vmem:[#allocation8 + $0x38] sm:$0xff]  ;;  %v1083_v43 = vld [vmem:[#allocation8 + $0x30] sm:$0xff]  ;;  %s1361_s16 = scalar_lea.hbm %s1360_s12, 8  ;;  %p1366_p12 = scmp.lt.s32.totalorder %s1360_s12, %s1694_s11 }
  0x45   : > { %686 = vmatpush.bf16.msra.mxu1 %v1084_v37  ;;  %v1082_v44 = vld [vmem:[#allocation8 + $0x28] sm:$0xff]  ;;  %v1081_v45 = vld [vmem:[#allocation8 + $0x20] sm:$0xff]  ;;  %v1080_v46 = vld [vmem:[#allocation8 + $0x18] sm:$0xff]  ;;  %p1362_p1 = scmp.ne.s32.totalorder %s1360_s12, %s1361_s16  ;;  %s1365_s28 = scalar_lea.hbm %s1694_s11, 16 }
  0x46   : > { %573 = vmatpush.bf16.msra.mxu0 %v1075_v9  ;;  %v1079_v47 = vld [vmem:[#allocation8 + $0x10] sm:$0xff]  ;;  %v1078_v48 = vld [vmem:[#allocation8 + $0x8] sm:$0xff]  ;;  %v1077_v49 = vld [vmem:[#allocation8] sm:$0xff]  ;;  %p1367_p7 = scmp.lt.s32.totalorder %s1365_s28, %s1361_s16 }
  0x47   : > { %v1185_v59 = vld [vmem:[%s1688_s5] ss:$0 sm:$0xff]  ;;  %v1092_v2 = vld [vmem:[#allocation10 + $0x38] sm:$0xff]  ;;  %p1363_p3 = pnand %p1362_p1, %p1574_p5 }
  0x48   : > { %v1186_v62 = vld [vmem:[%s1689_s6] ss:$0 sm:$0xff]  ;;  %808 = vmatpush.bf16.msra.mxu2 %v1092_v2  ;;  %p1368_p8 = por %p1367_p7, %p1366_p12 }
  0x49   : > { %687 = vmatpush.bf16.msra.mxu1 %v1083_v43  ;;  %v1187_v4 = vld [vmem:[%s1691_s8] ss:$0 sm:$0xff]  ;;  %p1364_p4 = pneg %p1363_p3 }
  0x4a   : > { %574 = vmatpush.bf16.msra.mxu0 %v1074_v10 }
  0x4b   : > { %p1369_p9 = pnand %p1368_p8, %p1364_p4 }
  0x4d   : > { %688 = vmatpush.bf16.msra.mxu1 %v1082_v44 }
  0x4e   : > { %575 = vmatpush.bf16.msra.mxu0 %v1073_v11  ;;  %v1088_v11 = vld [vmem:[#allocation10 + $0x18] sm:$0xff] }
  0x51   : > { %689 = vmatpush.bf16.msra.mxu1 %v1081_v45 }
  0x52   : > { %576 = vmatpush.bf16.msra.mxu0 %v1072_v12 }
  0x55   : > { %690 = vmatpush.bf16.msra.mxu1 %v1080_v46 }
  0x56   : > { %577 = vmatpush.bf16.msra.mxu0 %v1071_v13 }
  0x59   : > { %691 = vmatpush.bf16.msra.mxu1 %v1079_v47 }
  0x5a   : > { %578 = vmatpush.bf16.msra.mxu0 %v1070_v14 }
  0x5d   : > { %692 = vmatpush.bf16.msra.mxu1 %v1078_v48 }
  0x5e   : > { %579 = vmatpush.bf16.msra.mxu0 %v1069_v15  ;;  %v1087_v15 = vld [vmem:[#allocation10 + $0x10] sm:$0xff] }
  0x61   : > { %693 = vmatpush.bf16.msra.mxu1 %v1077_v49 }
  0xb4   : > { %v472_v3 = vpop.xlane.xlu0 %471 }
  0xb5   : > { %v473_v5 = vmul.f32 0.03125, %v472_v3  ;;  %v1091_v3 = vld [vmem:[#allocation10 + $0x30] sm:$0xff] }
  0xb6   : > { %809 = vmatpush.bf16.msra.mxu2 %v1091_v3 }
  0xb7   : > { %v474_v6 = vsub.f32 %v468_v0, %v473_v5  ;;  %v1090_v5 = vld [vmem:[#allocation10 + $0x28] sm:$0xff] }
  0xb9   : > { %v475_v7 = vmul.f32 %v474_v6, %v474_v6 }
  0xba   : > { %810 = vmatpush.bf16.msra.mxu2 %v1090_v5 }
  0xbb   : > { %v479_v8 = vsel %vm478_vm0, %v475_v7, 0.0 }
  0xbc   : > { %480 = vadd.xlane.f32.xlu0 %v479_v8  ;;  %v1089_v8 = vld [vmem:[#allocation10 + $0x20] sm:$0xff] }
  0xbe   : > { %811 = vmatpush.bf16.msra.mxu2 %v1089_v8 }
  0xc2   : > { %812 = vmatpush.bf16.msra.mxu2 %v1088_v11 }
  0xc6   : > { %813 = vmatpush.bf16.msra.mxu2 %v1087_v15 }
 0x12f   : > { %v481_v16 = vpop.xlane.xlu0 %480 }
 0x130   : > { %v482_v17 = vmul.f32 0.03125, %v481_v16 }
 0x132   : > { %v483_v18 = vadd.f32 1e-05, %v482_v17 }
 0x134   : > { %1189 = vrsqrt.f32 %v483_v18  ;;  %vm490_vm2 = vweird.f32 %v483_v18 }
 0x13a   : > { %v1190_v19 = vpop.eup %1189 }
 0x13b   : > { %v485_v20 = vmul.f32 %v1190_v19, %v483_v18  ;;  %vm491_vm1 = vweird.f32 %v1190_v19 }
 0x13c   : > { %vm492_vm3 = vmor %vm490_vm2, %vm491_vm1 }
 0x13d   : > { %v486_v21 = vmul.f32 %v1190_v19, %v485_v20  ;;  %v1086_v20 = vld [vmem:[#allocation10 + $0x8] sm:$0xff] }
 0x13e   : > { %814 = vmatpush.bf16.msra.mxu2 %v1086_v20 }
 0x13f   : > { %v487_v22 = vmul.f32 0.5, %v486_v21 }
 0x141   : > { %v488_v23 = vsub.f32 1.5, %v487_v22 }
 0x143   : > { %v489_v24 = vmul.f32 %v1190_v19, %v488_v23 }
 0x145   : > { %v493_v26 = vsel %vm492_vm3, %v1190_v19, %v489_v24  ;;  %v1085_v24 = vld [vmem:[#allocation10] sm:$0xff] }
 0x146   : > { %v494_v27 = vmul.f32 %v493_v26, %v474_v6  ;;  %815 = vmatpush.bf16.msra.mxu2 %v1085_v24 }
 0x148   : > { %v498_v29 = vmul.f32 %v1182_v25, %v494_v27 }
 0x14a   : > { %v502_v30 = vadd.f32 %v1183_v28, %v498_v29 }
 0x14c   : > { %v503_v31 = vpack.c.bf16 %v502_v30, %v502_v30 }
 0x14e   : > { %580 = vmatmul.bf16.vlgmr.msra.gmra.mxu0 %v503_v31 }
 0x1cb   : > { %v581_v33 = vpop.f32.mrf.mxu0 }
 0x1cc   : > { %v582_v34 = vadd.f32 %v1184_v32, %v581_v33 }
 0x1ce   : > { %v1630_v35 = vadd.f32 %v582_v34, %v468_v0 }
 0x1d0   : > { %588 = vadd.xlane.f32.xlu1 %v1630_v35 }
 0x1d3   : > { %v583_v36 = vpop.f32.mrf.mxu0 }
 0x243   : > { %v589_v38 = vpop.xlane.xlu1 %588 }
 0x244   : > { %v590_v39 = vmul.f32 0.03125, %v589_v38 }
 0x246   : > { %v591_v40 = vsub.f32 %v1630_v35, %v590_v39 }
 0x248   : > { %v592_v41 = vmul.f32 %v591_v40, %v591_v40 }
 0x24a   : > { %v593_v42 = vsel %vm478_vm0, %v592_v41, 0.0 }
 0x24b   : > { %594 = vadd.xlane.f32.xlu1 %v593_v42 }
 0x2be   : > { %v595_v50 = vpop.xlane.xlu1 %594 }
 0x2bf   : > { %v596_v51 = vmul.f32 0.03125, %v595_v50 }
 0x2c1   : > { %v597_v52 = vadd.f32 1e-05, %v596_v51 }
 0x2c3   : > { %1191 = vrsqrt.f32 %v597_v52  ;;  %vm604_vm5 = vweird.f32 %v597_v52 }
 0x2c9   : > { %v1192_v53 = vpop.eup %1191 }
 0x2ca   : > { %v599_v54 = vmul.f32 %v1192_v53, %v597_v52  ;;  %vm605_vm4 = vweird.f32 %v1192_v53 }
 0x2cb   : > { %vm606_vm6 = vmor %vm604_vm5, %vm605_vm4 }
 0x2cc   : > { %v600_v55 = vmul.f32 %v1192_v53, %v599_v54 }
 0x2ce   : > { %v601_v56 = vmul.f32 0.5, %v600_v55  ;;  %v1188_v55 = vld [vmem:[%s1693_s10] ss:$0 sm:$0xff] }
 0x2d0   : > { %v602_v57 = vsub.f32 1.5, %v601_v56 }
 0x2d2   : > { %v603_v58 = vmul.f32 %v1192_v53, %v602_v57 }
 0x2d4   : > { %v607_v60 = vsel %vm606_vm6, %v1192_v53, %v603_v58 }
 0x2d5   : > { %v608_v61 = vmul.f32 %v607_v60, %v591_v40 }
 0x2d7   : > { %v612_v63 = vmul.f32 %v1185_v59, %v608_v61 }
 0x2d9   : > { %v616_v0 = vadd.f32 %v1186_v62, %v612_v63 }
 0x2db   : > { %v617_v1 = vpack.c.bf16 %v616_v0, %v616_v0 }
 0x2dd   : > { %694 = vmatmul.bf16.vlgmr.msra.gmra.mxu1 %v617_v1 }
 0x35a   : > { %v695_v6 = vpop.f32.mrf.mxu1 }
 0x35b   : > { %v696_v7 = vadd.f32 %v1187_v4, %v695_v6 }
 0x35d   : > { %v700_v9 = vmul.f32 0.70710677, %v696_v7  ;;  %v699_v51 = vmul.f32 0.5, %v696_v7 }
 0x35f   : > { %v701_v10 = vmul.f32 %v700_v9, %v700_v9 }
 0x361   : > { %v702_v12 = vmin.f32 %v701_v10, 16.0 }
 0x362   : > { %v697_v13 = vpop.f32.mrf.mxu1 }
 0x363   : > { %v703_v14 = vmul.f32 2.1237322e-06, %v702_v12  ;;  %v714_v16 = vmul.f32 3.8918573e-05, %v702_v12 }
 0x365   : > { %v704_v17 = vadd.f32 0.00028619796, %v703_v14  ;;  %v715_v18 = vadd.f32 0.001143296, %v714_v16 }
 0x367   : > { %v705_v19 = vmul.f32 %v704_v17, %v702_v12  ;;  %v716_v21 = vmul.f32 %v715_v18, %v702_v12 }
 0x369   : > { %v717_v22 = vadd.f32 0.014752088, %v716_v21  ;;  %v706_v23 = vadd.f32 0.0036580483, %v705_v19 }
 0x36b   : > { %v718_v25 = vmul.f32 %v717_v22, %v702_v12  ;;  %v707_v27 = vmul.f32 %v706_v23, %v702_v12 }
 0x36d   : > { %v719_v26 = vadd.f32 0.112945676, %v718_v25  ;;  %v708_v30 = vadd.f32 0.05243302, %v707_v27 }
 0x36f   : > { %v720_v28 = vmul.f32 %v719_v26, %v702_v12  ;;  %v709_v33 = vmul.f32 %v708_v30, %v702_v12 }
 0x371   : > { %v721_v29 = vadd.f32 0.4994258, %v720_v28  ;;  %v710_v34 = vadd.f32 0.18741608, %v709_v33 }
 0x373   : > { %v722_v31 = vmul.f32 %v721_v29, %v702_v12  ;;  %v711_v37 = vmul.f32 %v710_v34, %v702_v12 }
 0x375   : > { %v723_v32 = vadd.f32 1.0, %v722_v31  ;;  %v712_v41 = vadd.f32 1.1283791, %v711_v37 }
 0x377   : > { %1193 = vrcp.f32 %v723_v32  ;;  %v735_v40 = vand.u32 2147483648, %v723_v32  ;;  %v733_v43 = vand.u32 2147483647, %v723_v32  ;;  %vm729_vm8 = vweird.f32 %v723_v32 }
 0x378   : > { %v713_v46 = vmul.f32 %v712_v41, %v700_v9 }
 0x379   : > { %v736_v45 = vor.u32 1.1754944e-38, %v735_v40  ;;  %vm734_vm10 = vcmp.eq.f32.partialorder %v733_v43, 8.507059e+37 }
 0x37d   : > { %v1194_v36 = vpop.eup %1193 }
 0x37e   : > { %v725_v38 = vmul.f32 %v1194_v36, %v723_v32  ;;  %vm730_vm7 = vweird.f32 %v1194_v36 }
 0x37f   : > { %vm731_vm9 = vmor %vm729_vm8, %vm730_vm7 }
 0x380   : > { %v726_v39 = vsub.f32 1.0, %v725_v38 }
 0x382   : > { %v727_v42 = vmul.f32 %v1194_v36, %v726_v39 }
 0x384   : > { %v728_v44 = vadd.f32 %v1194_v36, %v727_v42 }
 0x386   : > { %v732_v47 = vsel %vm731_vm9, %v1194_v36, %v728_v44 }
 0x387   : > { %v737_v48 = vsel %vm734_vm10, %v736_v45, %v732_v47 }
 0x388   : > { %v738_v49 = vmul.f32 %v737_v48, %v713_v46 }
 0x38a   : > { %v1032_v50 = vclamps-f32 %v738_v49, 1.0 }
 0x38c   : > { %v741_v52 = vadd.f32 1.0, %v1032_v50 }
 0x38e   : > { %v742_v53 = vmul.f32 %v741_v52, %v699_v51 }
 0x390   : > { %v743_v54 = vpack.c.bf16 %v742_v53, %v742_v53 }
 0x392   : > { %816 = vmatmul.bf16.vlgmr.msra.gmra.mxu2 %v743_v54 }
 0x415   : > { %v817_v56 = vpop.f32.mrf.mxu2 }
 0x416   : > { %v821_v57 = vadd.f32 %v817_v56, %v1630_v35 }
 0x418   : > { %v826_v58 = vadd.f32 %v1188_v55, %v821_v57 }
 0x41a   : > { %827 = vst [vmem:[%s467_s9] sm:$0xff] %v826_v58 }
 0x41b   : > { %1372 = shalt.err (!%p1369_p9)
}
 0x41c   : > { %1111 = dma.vmem_to_hbm [thread:$0]  (%p1574_p5), %s842_s25, 128, %s844_s15, %s829_s24  }
 0x41d   : > { %v819_v35 = vpop.f32.mrf.mxu2 }
 0x41e PF: > { %s855_s22 = sand.u32 1, %s1407_s17   ;;  %p1713_p10 = scmp.ge.s32.totalorder %s1419_s20, 2 }
 0x41f   : > { %s856_s14 = scalar_lea.sflag [#allocation4], %s855_s22 }
 0x420   : > { %p1131_p13 = pnand %p1713_p10, %p1578_p6 }
 0x422   : > { %p1132_p11 = pneg %p1131_p13 }
 0x424   : > { %1402 = dma.done.wait (%p1132_p11), %s856_s14, 128  }
 0x425   : > { %1404 = vsyncadd (%p1132_p11), %s856_s14, 4294967168  ;;  %s1714_s29 = sld [smem:[#allocation16_spill]]  ;;  %p26_p0 = scmp.ge.s32.totalorder %s1548_s21, 4  }
 0x426   : > { %s1715_s19 = sld [smem:[#allocation17_spill]]  ;;  %s1716_s17 = smov %s1411_s18 }
 0x427   : > { %s1718_s20 = smov %s1548_s21  ;;  %28 = sbr.rel (!%p26_p0) target bundleno = 12 (0xc), region = 125 }
 0x42b   : > { %s1717_s18 = smov %s1714_s29 }
 0x42c   :  { %862 = vsyncpa [#allocation3], 1 }
 0x42d   :  { %864 = vsyncpa [#allocation3 + $0x1], 1 }
 0x42e   :  { %865 = vsyncpa [#allocation6], 1 }
 0x42f   :  { %866 = vsyncpa [#allocation9], 1 }
 0x430   :  { %867 = vsyncpa [#allocation4], 1 }
 0x431   :  { %869 = vsyncpa [#allocation4 + $0x1], 1 }

// kernel: tpu_custom_call.1
= control target key start
LH: loop header
LB: loop body
LE: loop exit
PB: predicated region body
PF: predicated region fallthrough
CT: control target
= control target key end

     0   :  { %s1683_s0 = inlined_call_operand.hbm [shape: f32[16,128], index: 0, kind: input, shape index: {}]   ;;  %s1684_s1 = inlined_call_operand.hbm [shape: f32[1,128], index: 1, kind: input, shape index: {}]   ;;  %s1685_s2 = inlined_call_operand.vmem [shape: f32[1,128], index: 2, kind: input, shape index: {}]   ;;  %s1686_s3 = inlined_call_operand.hbm [shape: bf16[128,128], index: 3, kind: input, shape index: {}]   ;;  %s1687_s4 = inlined_call_operand.vmem [shape: f32[1,128], index: 4, kind: input, shape index: {}]   ;;  %s1688_s5 = inlined_call_operand.vmem [shape: f32[1,128], index: 5, kind: input, shape index: {}]   ;;  %s1689_s6 = inlined_call_operand.vmem [shape: f32[1,128], index: 6, kind: input, shape index: {}]   ;;  %s1690_s7 = inlined_call_operand.hbm [shape: bf16[128,128], index: 7, kind: input, shape index: {}]   ;;  %s1691_s8 = inlined_call_operand.vmem [shape: f32[1,128], index: 8, kind: input, shape index: {}]   ;;  %s1692_s9 = inlined_call_operand.hbm [shape: bf16[128,128], index: 9, kind: input, shape index: {}]   ;;  %s1693_s10 = inlined_call_operand.vmem [shape: f32[1,128], index: 10, kind: input, shape index: {}]   ;;  %s1694_s11 = inlined_call_operand.hbm [shape: f32[16,128], index: 11, kind: output, shape index: {}]  }
   0x1   :  { %1696 = sst [smem:[#allocation18_spill]] %s1684_s1 }
   0x2   :  { %1697 = sst [smem:[#allocation19_spill]] %s1686_s3 }
   0x3   :  { %1698 = sst [smem:[#allocation20_spill]] %s1690_s7 }
   0x4   :  { %1699 = sst [smem:[#allocation21_spill]] %s1692_s9 }
   0x5   :  { %16 = vsyncpa [#allocation3], 0 }
   0x6   :  { %18 = vsyncpa [#allocation3 + $0x1], 0 }
   0x7   :  { %19 = vsyncpa [#allocation6], 0 }
   0x8   :  { %20 = vsyncpa [#allocation9], 0 }
   0x9   :  { %21 = vsyncpa [#allocation4], 0 }
   0xa   :  { %23 = vsyncpa [#allocation4 + $0x1], 0  ;;  %s1487_s17 = smov 0   ;;  %s1489_s18 = smov 0  }
   0xb   :  { %s1491_s19 = smov 0   ;;  %s1493_s20 = smov 0  }
   0xc LB: > { %1700 = sst [smem:[#allocation16_spill]] %s1415_s19  ;;  %s1511_s24 = sadd.s32 4294967295, %s1419_s20   ;;  %s1419_s20 = sphi %s1493_s20, %s1718_s20   ;;  %s1415_s19 = sphi %s1491_s19, %s1715_s19   ;;  %s1411_s18 = sphi %s1489_s18, %s1717_s18   ;;  %s1407_s17 = sphi %s1487_s17, %s1716_s17  }
   0xd   : > { %s1701_s1 = sld [smem:[#allocation18_spill]]  ;;  %p953_p0 = scmp.ge.s32.totalorder %s1419_s20, 1 }
   0xe   : > { %p50_p1 = scmp.eq.s32.totalorder %s1511_s24, 0  ;;  %p296_p2 = scmp.lt.s32.totalorder %s1419_s20, 3 }
   0xf   : > { %s1421_s26 = smov [#allocation5]   ;;  %s1703_s7 = sld [smem:[#allocation20_spill]] }
  0x10   : > { %p1516_p3 = pnand %p953_p0, %p296_p2  ;;  %s310_s27 = sshll.u32 %s1421_s26, 4  ;;  %s311_s27 = int_to_ptr.vmem [resolvable:$true] %s310_s27 }
  0x11   : > { %s1705_s3 = sld [smem:[#allocation19_spill]]  ;;  %s1422_s16 = smov [#allocation8]  }
  0x12   : > { %p1113_p5 = pneg %p1516_p3  ;;  %s347_s21 = sshll.u32 %s1422_s16, 4  ;;  %s348_s21 = int_to_ptr.vmem [resolvable:$true] %s347_s21 }
  0x13   : > { %s308_s23 = sshll.u32 %s1701_s1, 4  ;;  %s1423_s22 = smov 64   ;;  %s309_s23 = int_to_ptr.hbm [resolvable:$true] %s308_s23 }
  0x14   : > { %p1528_p6 = pnand %p1113_p5, %p50_p1  ;;  %s1424_s26 = smov 4  }
  0x15   : > { %s345_s30 = sshll.u32 %s1703_s7, 4  ;;  %s1706_s9 = sld [smem:[#allocation21_spill]]  ;;  %s346_s30 = int_to_ptr.hbm [resolvable:$true] %s345_s30 }
  0x16   : > { %1116 = dma.hbm_to_vmem [thread:$0]  (!%p1528_p6), %s309_s23, 16, %s311_s27, [#allocation6]  }
  0x17   : > { %s322_s15 = sshll.u32 %s1705_s3, 4  ;;  %s1425_s14 = smov [#allocation7]   ;;  %s323_s15 = int_to_ptr.hbm [resolvable:$true] %s322_s15 }
  0x18   : > { %1122 = dma.hbm_to_vmem [thread:$0]  (!%p1528_p6), %s346_s30, 1024, %s348_s21, [#allocation9], %s1423_s22, %s1423_s22, %s1424_s26  }
  0x19   : > { %s324_s23 = sshll.u32 %s1425_s14, 4  ;;  %s1426_s27 = smov [#allocation10]   ;;  %s325_s23 = int_to_ptr.vmem [resolvable:$true] %s324_s23 }
  0x1a   : > { %1119 = dma.hbm_to_vmem [thread:$0]  (!%p1528_p6), %s323_s15, 1024, %s325_s23, [#allocation6], %s1423_s22, %s1423_s22, %s1424_s26  }
  0x1b   : > { %s362_s13 = sshll.u32 %s1706_s9, 4  ;;  %s364_s30 = sshll.u32 %s1426_s27, 4  ;;  %s363_s13 = int_to_ptr.hbm [resolvable:$true] %s362_s13  ;;  %s365_s30 = int_to_ptr.vmem [resolvable:$true] %s364_s30 }
  0x1c   : > { %1125 = dma.hbm_to_vmem [thread:$0]  (!%p1528_p6), %s363_s13, 1024, %s365_s30, [#allocation9], %s1423_s22, %s1423_s22, %s1424_s26  }
  0x1d   : > { %s952_s16 = sadd.s32 4294967294, %s1419_s20   ;;  %s1548_s21 = sadd.s32 1, %s1419_s20  }
  0x1e   : > { %s33_s28 = ssub.s32 %s1419_s20, %s1548_s21  ;;  %s36_s29 = sadd.s32 1, %s1415_s19 }
  0x1f   : > { %p34_p7 = scmp.eq.s32.totalorder %s33_s28, 0  ;;  %p43_p8 = scmp.ne.s32.totalorder %s1415_s19, %s1411_s18 }
  0x20   : > { %p44_p9 = scmp.eq.s32.totalorder %s1419_s20, 0  ;;  %p49_p10 = scmp.ne.s32.totalorder %s1411_s18, %s1407_s17 }
  0x21   : > { %s1559_s15 = scalar_select %p34_p7, %s1415_s19, %s36_s29  }
  0x22   : > { %p1561_p11 = por %p44_p9, %p43_p8  ;;  %p1567_p12 = por %p50_p1, %p49_p10 }
  0x23   : > { %1707 = sst [smem:[#allocation17_spill]] %s1559_s15  ;;  %p283_p13 = scmp.eq.s32.totalorder %s1511_s24, 1 }
  0x24   : > { %p289_p0 = scmp.eq.s32.totalorder %s952_s16, 1  ;;  %p1138_p2 = scmp.lt.s32.totalorder %s1419_s20, 2 }
  0x25   : > { %s381_s22 = sand.u32 1, %s1415_s19   ;;  %p1574_p5 = por %p283_p13, %p43_p8 }
  0x26   : > { %p1578_p6 = por %p289_p0, %p49_p10  ;;  %s959_s23 = sshll.u32 %s381_s22, 3 }
  0x27   : > { %s960_s27 = sshll.u32 %s1419_s20, 3  ;;  %s385_s1 = scalar_lea.vmem [#allocation2], %s959_s23 }
  0x28   : > { %s389_s29 = scalar_lea.hbm %s1683_s0, %s960_s27  ;;  %s393_s3 = sshll.u32 %s385_s1, 4  ;;  %s394_s3 = int_to_ptr.vmem [resolvable:$true] %s393_s3 }
  0x29   : > { %s391_s7 = sshll.u32 %s389_s29, 4  ;;  %p1588_p7 = pnand %p1138_p2, %p1561_p11  ;;  %s392_s7 = int_to_ptr.hbm [resolvable:$true] %s391_s7 }
  0x2a   : > { %s382_s9 = scalar_lea.sflag [#allocation3], %s381_s22  ;;  %s1315_s15 = sshra.s32 %s392_s7, 4  ;;  %s1316_s15 = int_to_ptr.hbm [resolvable:$true] %s1315_s15 }
  0x2b   : > { %s1317_s19 = scalar_lea.hbm %s1316_s15, 8  ;;  %p1319_p9 = pneg %p1588_p7 }
  0x2c   : > { %p1318_p8 = scmp.ne.s32.totalorder %s1316_s15, %s1317_s19  ;;  %s1322_s27 = scalar_lea.hbm %s1683_s0, 16 }
  0x2d   : > { %p1323_p11 = scmp.lt.s32.totalorder %s1316_s15, %s1683_s0  ;;  %p1324_p0 = scmp.lt.s32.totalorder %s1322_s27, %s1317_s19 }
  0x2e   : > { %p1320_p10 = pnand %p1319_p9, %p1318_p8 }
  0x2f   : > { %p1325_p2 = por %p1324_p0, %p1323_p11 }
  0x30   : > { %p1321_p13 = pneg %p1320_p10 }
  0x32   : > { %p1326_p4 = pnand %p1325_p2, %p1321_p13 }
  0x34   : > { %1329 = shalt.err (!%p1326_p4)
}
  0x35   : > { %1129 = dma.hbm_to_vmem [thread:$0]  (!%p1588_p7), %s392_s7, 128, %s394_s3, %s382_s9  }
  0x36   : > { %402 = sbr.rel (%p1516_p3) target bundleno = 1054 (0x41e), region = 64  ;;  %s1605_s22 = sand.u32 (!%p1516_p3), 1, %s1411_s18  }
  0x37   : > { %s962_s28 = sshll.u32 (!%p1516_p3), %s1605_s22, 3  ;;  %s405_s29 = scalar_lea.sflag (!%p1516_p3), [#allocation3], %s1605_s22 }
  0x38   : > { %s408_s19 = scalar_lea.vmem (!%p1516_p3), [#allocation2], %s962_s28 }
  0x3b   : > { %1390 = dma.done.wait (%p1567_p12), %s405_s29, 128  }
  0x3c   : > { %1392 = vsyncadd (%p1567_p12), %s405_s29, 4294967168 }
  0x3d   : > { %1394 = dma.done.wait (%p50_p1), [#allocation6], 1040  }
  0x3e   : > { %1396 = vsyncadd (%p50_p1), [#allocation6], 4294966256 }
  0x3f   : > { %1398 = dma.done.wait (%p50_p1), [#allocation9], 2048  }
  0x40   : > { %1400 = vsyncadd (%p50_p1), [#allocation9], 4294965248  ;;  %v468_v0 = vld [vmem:[%s408_s19] sm:$0xff]  ;;  %v476_v2 = vlaneseq  ;;  %v1073_v11 = vld [vmem:[#allocation7 + $0x20] sm:$0xff]  ;;  %s1066_s30 = sshll.u32 %s1511_s24, 3  ;;  %s467_s9 = scalar_lea.vmem [#allocation11], %s962_s28 }
  0x41   : > { %471 = vadd.xlane.f32.xlu0 %v468_v0  ;;  %v1076_v1 = vld [vmem:[#allocation7 + $0x38] sm:$0xff]  ;;  %v1075_v9 = vld [vmem:[#allocation7 + $0x30] sm:$0xff]  ;;  %v1074_v10 = vld [vmem:[#allocation7 + $0x28] sm:$0xff]  ;;  %s839_s19 = scalar_lea.hbm %s1694_s11, %s1066_s30  ;;  %s841_s25 = sshll.u32 %s467_s9, 4  ;;  %s842_s25 = int_to_ptr.vmem [resolvable:$true] %s841_s25 }
  0x42   : > { %572 = vmatpush.bf16.msra.mxu0 %v1076_v1  ;;  %v477_v4 = vand.u32 127, %v476_v2  ;;  %v1072_v12 = vld [vmem:[#allocation7 + $0x18] sm:$0xff]  ;;  %v1071_v13 = vld [vmem:[#allocation7 + $0x10] sm:$0xff]  ;;  %v1070_v14 = vld [vmem:[#allocation7 + $0x8] sm:$0xff]  ;;  %s843_s15 = sshll.u32 %s839_s19, 4  ;;  %s829_s24 = scalar_lea.sflag [#allocation4], %s1605_s22  ;;  %s844_s15 = int_to_ptr.hbm [resolvable:$true] %s843_s15 }
  0x43   : > { %v1069_v15 = vld [vmem:[#allocation7] sm:$0xff]  ;;  %v1182_v25 = vld [vmem:[#allocation5] ss:$0 sm:$0xff]  ;;  %v1183_v28 = vld [vmem:[%s1685_s2] ss:$0 sm:$0xff]  ;;  %s1359_s12 = sshra.s32 %s844_s15, 4  ;;  %s1360_s12 = int_to_ptr.hbm [resolvable:$true] %s1359_s12 }
  0x44   : > { %vm478_vm0 = vcmp.lt.s32.totalorder %v477_v4, 32  ;;  %v1184_v32 = vld [vmem:[%s1687_s4] ss:$0 sm:$0xff]  ;;  %v1084_v37 = vld [vmem:[#allocation8 + $0x38] sm:$0xff]  ;;  %v1083_v43 = vld [vmem:[#allocation8 + $0x30] sm:$0xff]  ;;  %s1361_s16 = scalar_lea.hbm %s1360_s12, 8  ;;  %p1366_p12 = scmp.lt.s32.totalorder %s1360_s12, %s1694_s11 }
  0x45   : > { %686 = vmatpush.bf16.msra.mxu1 %v1084_v37  ;;  %v1082_v44 = vld [vmem:[#allocation8 + $0x28] sm:$0xff]  ;;  %v1081_v45 = vld [vmem:[#allocation8 + $0x20] sm:$0xff]  ;;  %v1080_v46 = vld [vmem:[#allocation8 + $0x18] sm:$0xff]  ;;  %p1362_p1 = scmp.ne.s32.totalorder %s1360_s12, %s1361_s16  ;;  %s1365_s28 = scalar_lea.hbm %s1694_s11, 16 }
  0x46   : > { %573 = vmatpush.bf16.msra.mxu0 %v1075_v9  ;;  %v1079_v47 = vld [vmem:[#allocation8 + $0x10] sm:$0xff]  ;;  %v1078_v48 = vld [vmem:[#allocation8 + $0x8] sm:$0xff]  ;;  %v1077_v49 = vld [vmem:[#allocation8] sm:$0xff]  ;;  %p1367_p7 = scmp.lt.s32.totalorder %s1365_s28, %s1361_s16 }
  0x47   : > { %v1185_v59 = vld [vmem:[%s1688_s5] ss:$0 sm:$0xff]  ;;  %v1092_v2 = vld [vmem:[#allocation10 + $0x38] sm:$0xff]  ;;  %p1363_p3 = pnand %p1362_p1, %p1574_p5 }
  0x48   : > { %v1186_v62 = vld [vmem:[%s1689_s6] ss:$0 sm:$0xff]  ;;  %808 = vmatpush.bf16.msra.mxu2 %v1092_v2  ;;  %p1368_p8 = por %p1367_p7, %p1366_p12 }
  0x49   : > { %687 = vmatpush.bf16.msra.mxu1 %v1083_v43  ;;  %v1187_v4 = vld [vmem:[%s1691_s8] ss:$0 sm:$0xff]  ;;  %p1364_p4 = pneg %p1363_p3 }
  0x4a   : > { %574 = vmatpush.bf16.msra.mxu0 %v1074_v10 }
  0x4b   : > { %p1369_p9 = pnand %p1368_p8, %p1364_p4 }
  0x4d   : > { %688 = vmatpush.bf16.msra.mxu1 %v1082_v44 }
  0x4e   : > { %575 = vmatpush.bf16.msra.mxu0 %v1073_v11  ;;  %v1088_v11 = vld [vmem:[#allocation10 + $0x18] sm:$0xff] }
  0x51   : > { %689 = vmatpush.bf16.msra.mxu1 %v1081_v45 }
  0x52   : > { %576 = vmatpush.bf16.msra.mxu0 %v1072_v12 }
  0x55   : > { %690 = vmatpush.bf16.msra.mxu1 %v1080_v46 }
  0x56   : > { %577 = vmatpush.bf16.msra.mxu0 %v1071_v13 }
  0x59   : > { %691 = vmatpush.bf16.msra.mxu1 %v1079_v47 }
  0x5a   : > { %578 = vmatpush.bf16.msra.mxu0 %v1070_v14 }
  0x5d   : > { %692 = vmatpush.bf16.msra.mxu1 %v1078_v48 }
  0x5e   : > { %579 = vmatpush.bf16.msra.mxu0 %v1069_v15  ;;  %v1087_v15 = vld [vmem:[#allocation10 + $0x10] sm:$0xff] }
  0x61   : > { %693 = vmatpush.bf16.msra.mxu1 %v1077_v49 }
  0xb4   : > { %v472_v3 = vpop.xlane.xlu0 %471 }
  0xb5   : > { %v473_v5 = vmul.f32 0.03125, %v472_v3  ;;  %v1091_v3 = vld [vmem:[#allocation10 + $0x30] sm:$0xff] }
  0xb6   : > { %809 = vmatpush.bf16.msra.mxu2 %v1091_v3 }
  0xb7   : > { %v474_v6 = vsub.f32 %v468_v0, %v473_v5  ;;  %v1090_v5 = vld [vmem:[#allocation10 + $0x28] sm:$0xff] }
  0xb9   : > { %v475_v7 = vmul.f32 %v474_v6, %v474_v6 }
  0xba   : > { %810 = vmatpush.bf16.msra.mxu2 %v1090_v5 }
  0xbb   : > { %v479_v8 = vsel %vm478_vm0, %v475_v7, 0.0 }
  0xbc   : > { %480 = vadd.xlane.f32.xlu0 %v479_v8  ;;  %v1089_v8 = vld [vmem:[#allocation10 + $0x20] sm:$0xff] }
  0xbe   : > { %811 = vmatpush.bf16.msra.mxu2 %v1089_v8 }
  0xc2   : > { %812 = vmatpush.bf16.msra.mxu2 %v1088_v11 }
  0xc6   : > { %813 = vmatpush.bf16.msra.mxu2 %v1087_v15 }
 0x12f   : > { %v481_v16 = vpop.xlane.xlu0 %480 }
 0x130   : > { %v482_v17 = vmul.f32 0.03125, %v481_v16 }
 0x132   : > { %v483_v18 = vadd.f32 1e-05, %v482_v17 }
 0x134   : > { %1189 = vrsqrt.f32 %v483_v18  ;;  %vm490_vm2 = vweird.f32 %v483_v18 }
 0x13a   : > { %v1190_v19 = vpop.eup %1189 }
 0x13b   : > { %v485_v20 = vmul.f32 %v1190_v19, %v483_v18  ;;  %vm491_vm1 = vweird.f32 %v1190_v19 }
 0x13c   : > { %vm492_vm3 = vmor %vm490_vm2, %vm491_vm1 }
 0x13d   : > { %v486_v21 = vmul.f32 %v1190_v19, %v485_v20  ;;  %v1086_v20 = vld [vmem:[#allocation10 + $0x8] sm:$0xff] }
 0x13e   : > { %814 = vmatpush.bf16.msra.mxu2 %v1086_v20 }
 0x13f   : > { %v487_v22 = vmul.f32 0.5, %v486_v21 }
 0x141   : > { %v488_v23 = vsub.f32 1.5, %v487_v22 }
 0x143   : > { %v489_v24 = vmul.f32 %v1190_v19, %v488_v23 }
 0x145   : > { %v493_v26 = vsel %vm492_vm3, %v1190_v19, %v489_v24  ;;  %v1085_v24 = vld [vmem:[#allocation10] sm:$0xff] }
 0x146   : > { %v494_v27 = vmul.f32 %v493_v26, %v474_v6  ;;  %815 = vmatpush.bf16.msra.mxu2 %v1085_v24 }
 0x148   : > { %v498_v29 = vmul.f32 %v1182_v25, %v494_v27 }
 0x14a   : > { %v502_v30 = vadd.f32 %v1183_v28, %v498_v29 }
 0x14c   : > { %v503_v31 = vpack.c.bf16 %v502_v30, %v502_v30 }
 0x14e   : > { %580 = vmatmul.bf16.vlgmr.msra.gmra.mxu0 %v503_v31 }
 0x1cb   : > { %v581_v33 = vpop.f32.mrf.mxu0 }
 0x1cc   : > { %v582_v34 = vadd.f32 %v1184_v32, %v581_v33 }
 0x1ce   : > { %v1630_v35 = vadd.f32 %v582_v34, %v468_v0 }
 0x1d0   : > { %588 = vadd.xlane.f32.xlu1 %v1630_v35 }
 0x1d3   : > { %v583_v36 = vpop.f32.mrf.mxu0 }
 0x243   : > { %v589_v38 = vpop.xlane.xlu1 %588 }
 0x244   : > { %v590_v39 = vmul.f32 0.03125, %v589_v38 }
 0x246   : > { %v591_v40 = vsub.f32 %v1630_v35, %v590_v39 }
 0x248   : > { %v592_v41 = vmul.f32 %v591_v40, %v591_v40 }
 0x24a   : > { %v593_v42 = vsel %vm478_vm0, %v592_v41, 0.0 }
 0x24b   : > { %594 = vadd.xlane.f32.xlu1 %v593_v42 }
 0x2be   : > { %v595_v50 = vpop.xlane.xlu1 %594 }
 0x2bf   : > { %v596_v51 = vmul.f32 0.03125, %v595_v50 }
 0x2c1   : > { %v597_v52 = vadd.f32 1e-05, %v596_v51 }
 0x2c3   : > { %1191 = vrsqrt.f32 %v597_v52  ;;  %vm604_vm5 = vweird.f32 %v597_v52 }
 0x2c9   : > { %v1192_v53 = vpop.eup %1191 }
 0x2ca   : > { %v599_v54 = vmul.f32 %v1192_v53, %v597_v52  ;;  %vm605_vm4 = vweird.f32 %v1192_v53 }
 0x2cb   : > { %vm606_vm6 = vmor %vm604_vm5, %vm605_vm4 }
 0x2cc   : > { %v600_v55 = vmul.f32 %v1192_v53, %v599_v54 }
 0x2ce   : > { %v601_v56 = vmul.f32 0.5, %v600_v55  ;;  %v1188_v55 = vld [vmem:[%s1693_s10] ss:$0 sm:$0xff] }
 0x2d0   : > { %v602_v57 = vsub.f32 1.5, %v601_v56 }
 0x2d2   : > { %v603_v58 = vmul.f32 %v1192_v53, %v602_v57 }
 0x2d4   : > { %v607_v60 = vsel %vm606_vm6, %v1192_v53, %v603_v58 }
 0x2d5   : > { %v608_v61 = vmul.f32 %v607_v60, %v591_v40 }
 0x2d7   : > { %v612_v63 = vmul.f32 %v1185_v59, %v608_v61 }
 0x2d9   : > { %v616_v0 = vadd.f32 %v1186_v62, %v612_v63 }
 0x2db   : > { %v617_v1 = vpack.c.bf16 %v616_v0, %v616_v0 }
 0x2dd   : > { %694 = vmatmul.bf16.vlgmr.msra.gmra.mxu1 %v617_v1 }
 0x35a   : > { %v695_v6 = vpop.f32.mrf.mxu1 }
 0x35b   : > { %v696_v7 = vadd.f32 %v1187_v4, %v695_v6 }
 0x35d   : > { %v700_v9 = vmul.f32 0.70710677, %v696_v7  ;;  %v699_v51 = vmul.f32 0.5, %v696_v7 }
 0x35f   : > { %v701_v10 = vmul.f32 %v700_v9, %v700_v9 }
 0x361   : > { %v702_v12 = vmin.f32 %v701_v10, 16.0 }
 0x362   : > { %v697_v13 = vpop.f32.mrf.mxu1 }
 0x363   : > { %v703_v14 = vmul.f32 2.1237322e-06, %v702_v12  ;;  %v714_v16 = vmul.f32 3.8918573e-05, %v702_v12 }
 0x365   : > { %v704_v17 = vadd.f32 0.00028619796, %v703_v14  ;;  %v715_v18 = vadd.f32 0.001143296, %v714_v16 }
 0x367   : > { %v705_v19 = vmul.f32 %v704_v17, %v702_v12  ;;  %v716_v21 = vmul.f32 %v715_v18, %v702_v12 }
 0x369   : > { %v717_v22 = vadd.f32 0.014752088, %v716_v21  ;;  %v706_v23 = vadd.f32 0.0036580483, %v705_v19 }
 0x36b   : > { %v718_v25 = vmul.f32 %v717_v22, %v702_v12  ;;  %v707_v27 = vmul.f32 %v706_v23, %v702_v12 }
 0x36d   : > { %v719_v26 = vadd.f32 0.112945676, %v718_v25  ;;  %v708_v30 = vadd.f32 0.05243302, %v707_v27 }
 0x36f   : > { %v720_v28 = vmul.f32 %v719_v26, %v702_v12  ;;  %v709_v33 = vmul.f32 %v708_v30, %v702_v12 }
 0x371   : > { %v721_v29 = vadd.f32 0.4994258, %v720_v28  ;;  %v710_v34 = vadd.f32 0.18741608, %v709_v33 }
 0x373   : > { %v722_v31 = vmul.f32 %v721_v29, %v702_v12  ;;  %v711_v37 = vmul.f32 %v710_v34, %v702_v12 }
 0x375   : > { %v723_v32 = vadd.f32 1.0, %v722_v31  ;;  %v712_v41 = vadd.f32 1.1283791, %v711_v37 }
 0x377   : > { %1193 = vrcp.f32 %v723_v32  ;;  %v735_v40 = vand.u32 2147483648, %v723_v32  ;;  %v733_v43 = vand.u32 2147483647, %v723_v32  ;;  %vm729_vm8 = vweird.f32 %v723_v32 }
 0x378   : > { %v713_v46 = vmul.f32 %v712_v41, %v700_v9 }
 0x379   : > { %v736_v45 = vor.u32 1.1754944e-38, %v735_v40  ;;  %vm734_vm10 = vcmp.eq.f32.partialorder %v733_v43, 8.507059e+37 }
 0x37d   : > { %v1194_v36 = vpop.eup %1193 }
 0x37e   : > { %v725_v38 = vmul.f32 %v1194_v36, %v723_v32  ;;  %vm730_vm7 = vweird.f32 %v1194_v36 }
 0x37f   : > { %vm731_vm9 = vmor %vm729_vm8, %vm730_vm7 }
 0x380   : > { %v726_v39 = vsub.f32 1.0, %v725_v38 }
 0x382   : > { %v727_v42 = vmul.f32 %v1194_v36, %v726_v39 }
 0x384   : > { %v728_v44 = vadd.f32 %v1194_v36, %v727_v42 }
 0x386   : > { %v732_v47 = vsel %vm731_vm9, %v1194_v36, %v728_v44 }
 0x387   : > { %v737_v48 = vsel %vm734_vm10, %v736_v45, %v732_v47 }
 0x388   : > { %v738_v49 = vmul.f32 %v737_v48, %v713_v46 }
 0x38a   : > { %v1032_v50 = vclamps-f32 %v738_v49, 1.0 }
 0x38c   : > { %v741_v52 = vadd.f32 1.0, %v1032_v50 }
 0x38e   : > { %v742_v53 = vmul.f32 %v741_v52, %v699_v51 }
 0x390   : > { %v743_v54 = vpack.c.bf16 %v742_v53, %v742_v53 }
 0x392   : > { %816 = vmatmul.bf16.vlgmr.msra.gmra.mxu2 %v743_v54 }
 0x415   : > { %v817_v56 = vpop.f32.mrf.mxu2 }
 0x416   : > { %v821_v57 = vadd.f32 %v817_v56, %v1630_v35 }
 0x418   : > { %v826_v58 = vadd.f32 %v1188_v55, %v821_v57 }
 0x41a   : > { %827 = vst [vmem:[%s467_s9] sm:$0xff] %v826_v58 }
 0x41b   : > { %1372 = shalt.err (!%p1369_p9)
}
 0x41c   : > { %1111 = dma.vmem_to_hbm [thread:$0]  (%p1574_p5), %s842_s25, 128, %s844_s15, %s829_s24  }
 0x41d   : > { %v819_v35 = vpop.f32.mrf.mxu2 }
 0x41e PF: > { %s855_s22 = sand.u32 1, %s1407_s17   ;;  %p1713_p10 = scmp.ge.s32.totalorder %s1419_s20, 2 }
 0x41f   : > { %s856_s14 = scalar_lea.sflag [#allocation4], %s855_s22 }
 0x420   : > { %p1131_p13 = pnand %p1713_p10, %p1578_p6 }
 0x422   : > { %p1132_p11 = pneg %p1131_p13 }
 0x424   : > { %1402 = dma.done.wait (%p1132_p11), %s856_s14, 128  }
 0x425   : > { %1404 = vsyncadd (%p1132_p11), %s856_s14, 4294967168  ;;  %s1714_s29 = sld [smem:[#allocation16_spill]]  ;;  %p26_p0 = scmp.ge.s32.totalorder %s1548_s21, 4  }
 0x426   : > { %s1715_s19 = sld [smem:[#allocation17_spill]]  ;;  %s1716_s17 = smov %s1411_s18 }
 0x427   : > { %s1718_s20 = smov %s1548_s21  ;;  %28 = sbr.rel (!%p26_p0) target bundleno = 12 (0xc), region = 125 }
 0x42b   : > { %s1717_s18 = smov %s1714_s29 }
 0x42c   :  { %862 = vsyncpa [#allocation3], 1 }
 0x42d   :  { %864 = vsyncpa [#allocation3 + $0x1], 1 }
 0x42e   :  { %865 = vsyncpa [#allocation6], 1 }
 0x42f   :  { %866 = vsyncpa [#allocation9], 1 }
 0x430   :  { %867 = vsyncpa [#allocation4], 1 }
 0x431   :  { %869 = vsyncpa [#allocation4 + $0x1], 1 }

</bundles_post_ra>
